<compile_context>
chip_gen: v7x
topology: tpu7x:2x2x1
jax: 0.10.0
libtpu: 0.0.40
codegen_flags: <defaults>
</compile_context>

<pallas_src>
import functools

import numpy as np
import jax
import jax.numpy as jnp
from jax import lax
from jax.experimental import pallas as pl
from jax.experimental.pallas import tpu as pltpu

_BOX_CODE_SIZE = 7 + 2 + 9  # == 18, matches the module-level _box_code_size


# ----------------------------- fused Pallas kernel ----------------------------

def _fused_large_head_kernel(taps1_ref, w1_ref, s1_ref, t1_ref,
                             w2_ref, s2_ref, t2_ref,
                             w3_ref, s3_ref, t3_ref,
                             wh_ref, bh_ref,
                             o_ref,
                             hpad_ref, tapbuf_ref, *, B, Ho, Wo):
    """Fused conv1(s2) -> conv2 -> conv3 -> 1x1 heads, batch folded into rows.

    taps1_ref : (B*M, 9*Cin)   bf16  conv1 im2col taps (stride-2, pad 1), K folded
    w1_ref    : (9*Cin, 64)    bf16  folded conv1 weights
    w2_ref    : (576, 64)      bf16  folded conv2 weights
    w3_ref    : (576, 64)      bf16  folded conv3 weights
    wh_ref    : (64, CT_pad)   bf16  concatenated+zero-padded 1x1 head weights
    s*_ref/t*_ref : (1, 64)    f32   folded BatchNorm scale/shift
    bh_ref    : (1, CT_pad)    f32   concatenated+zero-padded head biases
    o_ref     : (B*M, CT_pad)  f32   lane-dense concatenated head outputs
    hpad_ref  : (B, Ho+2, Wo+2, 64) f32  scratch: zero halo ring + feature map
    tapbuf_ref: (B*M, 576)     bf16       scratch: folded 3x3 taps (MXU lhs)
    """
    M = Ho * Wo
    BM = B * M
    C = 64
    f32 = jnp.float32

    def bn_relu(acc_f32, s_ref, t_ref):
        return jnp.maximum(acc_f32 * s_ref[...] + t_ref[...], 0.0)

    # ---- conv1: single folded-K matmul (K = 9*Cin), f32 accumulate ------------
    acc1 = jnp.dot(taps1_ref[...], w1_ref[...],
                   preferred_element_type=f32)
    h1 = bn_relu(acc1, s1_ref, t1_ref)                            # (B*M, 64) f32

    # ---- ring-only zeroing of the halo (4 thin slabs, single grid step) -------
    # The interior is overwritten immediately below; only the 1-pixel ring must be
    # zero and it is never touched again (both 3x3 convs reuse it).
    hpad_ref[:, 0:1, :, :] = jnp.zeros((B, 1, Wo + 2, C), f32)
    hpad_ref[:, Ho + 1:Ho + 2, :, :] = jnp.zeros((B, 1, Wo + 2, C), f32)
    hpad_ref[:, :, 0:1, :] = jnp.zeros((B, Ho + 2, 1, C), f32)
    hpad_ref[:, :, Wo + 1:Wo + 2, :] = jnp.zeros((B, Ho + 2, 1, C), f32)

    hpad_ref[:, 1:Ho + 1, 1:Wo + 1, :] = h1.reshape(B, Ho, Wo, C)

    def conv3x3(w_ref, s_ref, t_ref):
        # Build the 9 shifted taps from VMEM (no HBM im2col) and fold them into a
        # single K = 9*64 = 576 contraction so the MXU sees one big matmul.
        def tap(j):
            dy, dx = divmod(j, 3)
            t = hpad_ref[:, dy:dy + Ho, dx:dx + Wo, :]            # (B,Ho,Wo,64)
            # Wo == 8 keeps this reshape a free relayout (sublane-tile aligned);
            # the bf16 cast is the single quantization point per tap.
            return t.reshape(BM, C).astype(tapbuf_ref.dtype)

        # Pair-packed stores: 4 full 128-lane vreg-width stores ...
        for p in range(4):
            tapbuf_ref[:, 2 * p * C:(2 * p + 2) * C] = jnp.concatenate(
                [tap(2 * p), tap(2 * p + 1)], axis=-1)
        # ... plus one 64-wide tail at a 128-aligned lane offset (512).
        tapbuf_ref[:, 8 * C:9 * C] = tap(8)

        acc = jnp.dot(tapbuf_ref[...], w_ref[...],
                      preferred_element_type=f32)                 # (B*M, 64) f32
        return bn_relu(acc, s_ref, t_ref)

    h2 = conv3x3(w2_ref, s2_ref, t2_ref)
    hpad_ref[:, 1:Ho + 1, 1:Wo + 1, :] = h2.reshape(B, Ho, Wo, C)
    h3 = conv3x3(w3_ref, s3_ref, t3_ref)

    # ---- fused 1x1 heads: one (B*M, 64) @ (64, CT_pad) matmul + bias ----------
    # CT_pad is a multiple of 128, so this store is lane-dense / unmasked.
    y = jnp.dot(h3.astype(wh_ref.dtype), wh_ref[...],
                preferred_element_type=f32) + bh_ref[...]
    o_ref[...] = y.astype(o_ref.dtype)


def fused_large_head(taps1, w1f, s1, t1, w2f, s2, t2, w3f, s3, t3, wh, bh,
                     *, B, Ho, Wo):
    """taps1: (B*M, 9*Cin) -> (B*M, C_total) with all FLOPs inside one kernel."""
    BM, K1 = taps1.shape
    C = 64
    CT = wh.shape[1]
    # Pad the fused head output channels to a multiple of 128 for lane-dense
    # stores (the padded columns are zero weights/biases, sliced off below).
    CTP = max(128, ((CT + 127) // 128) * 128)
    bf16, f32 = jnp.bfloat16, jnp.float32

    wh_p = jnp.pad(wh, ((0, 0), (0, CTP - CT)))
    bh_p = jnp.pad(bh, (0, CTP - CT)).reshape(1, CTP).astype(f32)

    def vrow(v):
        return v.reshape(1, -1).astype(f32)

    kern = functools.partial(_fused_large_head_kernel, B=B, Ho=Ho, Wo=Wo)
    y = pl.pallas_call(
        kern,
        out_shape=jax.ShapeDtypeStruct((BM, CTP), f32),
        grid=(1,),   # batch is folded into rows; TODO(synk): spatial row tiles at
                     # production sizes (see header).
        in_specs=[
            pl.BlockSpec((BM, K1), lambda i: (0, 0)),     # conv1 taps
            pl.BlockSpec((K1, C), lambda i: (0, 0)),      # w1 (folded)
            pl.BlockSpec((1, C), lambda i: (0, 0)),       # s1
            pl.BlockSpec((1, C), lambda i: (0, 0)),       # t1
            pl.BlockSpec((9 * C, C), lambda i: (0, 0)),   # w2 (folded)
            pl.BlockSpec((1, C), lambda i: (0, 0)),       # s2
            pl.BlockSpec((1, C), lambda i: (0, 0)),       # t2
            pl.BlockSpec((9 * C, C), lambda i: (0, 0)),   # w3 (folded)
            pl.BlockSpec((1, C), lambda i: (0, 0)),       # s3
            pl.BlockSpec((1, C), lambda i: (0, 0)),       # t3
            pl.BlockSpec((C, CTP), lambda i: (0, 0)),     # head weights (padded)
            pl.BlockSpec((1, CTP), lambda i: (0, 0)),     # head biases (padded)
        ],
        out_specs=pl.BlockSpec((BM, CTP), lambda i: (0, 0)),
        scratch_shapes=[
            pltpu.VMEM((B, Ho + 2, Wo + 2, C), f32),   # padded feature map
            pltpu.VMEM((BM, 9 * C), bf16),             # folded 3x3 taps (MXU lhs)
        ],
        # Footprint is < 1 MiB; the default scoped-VMEM limit is ample on all
        # chips, so no vmem_limit_bytes override (per perf review).
        compiler_params=pltpu.CompilerParams(
            dimension_semantics=("arbitrary",)),
    )(taps1.astype(bf16), w1f.astype(bf16), vrow(s1), vrow(t1),
      w2f.astype(bf16), vrow(s2), vrow(t2),
      w3f.astype(bf16), vrow(s3), vrow(t3),
      wh_p.astype(bf16), bh_p)
    return y[:, :CT]


# ------------------------------- parameters ----------------------------------

def _fold_bn(gamma, beta, mean, var, eps=1e-3):
    scale = gamma / jnp.sqrt(var + eps)
    shift = beta - mean * scale
    return scale, shift


def init_params(key, num_filters, num_class, num_anchor_per_loc,
                num_direction_bins, encode_background_as_zeros=True):
    ks = jax.random.split(key, 12)

    def conv_w(k, cin, cout):  # HWIO
        return (0.05 * jax.random.normal(k, (3, 3, cin, cout))).astype(jnp.float32)

    def bn(k, c):
        k1, k2, k3, k4 = jax.random.split(k, 4)
        gamma = 1.0 + 0.1 * jax.random.normal(k1, (c,))
        beta = 0.1 * jax.random.normal(k2, (c,))
        mean = 0.1 * jax.random.normal(k3, (c,))
        var = 0.5 + 0.5 * jax.random.uniform(k4, (c,))
        return _fold_bn(gamma, beta, mean, var)

    if encode_background_as_zeros:
        num_cls = num_anchor_per_loc * num_class
    else:
        num_cls = num_anchor_per_loc * (num_class + 1)

    p = {}
    p['w1'] = conv_w(ks[0], num_filters, 64)
    p['s1'], p['t1'] = bn(ks[1], 64)
    p['w2'] = conv_w(ks[2], 64, 64)
    p['s2'], p['t2'] = bn(ks[3], 64)
    p['w3'] = conv_w(ks[4], 64, 64)
    p['s3'], p['t3'] = bn(ks[5], 64)
    p['w_cls'] = 0.05 * jax.random.normal(ks[6], (64, num_cls))
    p['b_cls'] = jnp.full((num_cls,), -float(np.log((1 - 0.01) / 0.01)))
    p['w_box'] = 0.05 * jax.random.normal(
        ks[7], (64, num_anchor_per_loc * _BOX_CODE_SIZE))
    p['b_box'] = 0.01 * jax.random.normal(
        ks[8], (num_anchor_per_loc * _BOX_CODE_SIZE,))
    p['w_dir'] = 0.05 * jax.random.normal(
        ks[9], (64, num_anchor_per_loc * num_direction_bins))
    p['b_dir'] = 0.01 * jax.random.normal(
        ks[10], (num_anchor_per_loc * num_direction_bins,))
    return jax.tree.map(lambda a: jnp.asarray(a, jnp.float32), p)


# ------------------------------- forward pass ---------------------------------

def large_head_forward(x_nchw, idx, params, *, num_class, num_anchor_per_loc,
                       num_direction_bins, use_direction_classifier=True):
    del idx  # unused in the PyTorch forward as well
    x = jnp.transpose(x_nchw, (0, 2, 3, 1)).astype(jnp.float32)  # NCHW -> NHWC
    B, H, W, Cin = x.shape
    A = num_anchor_per_loc
    Ho, Wo = (H - 1) // 2 + 1, (W - 1) // 2 + 1
    M = Ho * Wo

    # conv1 taps (3x3, stride 2, pad 1) folded to K = 9*Cin.  Cin is tiny (4), so
    # this small im2col is cheap glue; conv2/conv3 taps are built inside the kernel.
    xp = jnp.pad(x, ((0, 0), (1, 1), (1, 1), (0, 0)))
    taps1 = jnp.concatenate(
        [xp[:, dy:dy + 2 * Ho:2, dx:dx + 2 * Wo:2, :].reshape(B, M, Cin)
         for dy in range(3) for dx in range(3)], axis=-1)        # (B, M, 9*Cin)
    taps1 = taps1.reshape(B * M, 9 * Cin)                        # fold batch in

    w1f = params['w1'].reshape(9 * Cin, 64)
    w2f = params['w2'].reshape(9 * 64, 64)
    w3f = params['w3'].reshape(9 * 64, 64)

    # Fuse the three 1x1 heads into one matmul (split columns afterwards).
    n_box = A * _BOX_CODE_SIZE
    n_cls = params['w_cls'].shape[1]
    head_ws = [params['w_box'], params['w_cls']]
    head_bs = [params['b_box'], params['b_cls']]
    if use_direction_classifier:
        head_ws.append(params['w_dir'])
        head_bs.append(params['b_dir'])
    wh = jnp.concatenate(head_ws, axis=-1)
    bh = jnp.concatenate(head_bs)

    y = fused_large_head(taps1, w1f, params['s1'], params['t1'],
                         w2f, params['s2'], params['t2'],
                         w3f, params['s3'], params['t3'],
                         wh, bh, B=B, Ho=Ho, Wo=Wo)              # (B*M, C_total)
    y = y.reshape(B, M, -1)

    box = y[..., :n_box]
    cls = y[..., n_box:n_box + n_cls]

    # torch: view(B, A, C, H, W).permute(0,1,3,4,2).view(B, -1, C)
    def torch_head_flatten(t, c):
        t = t.reshape(B, Ho, Wo, A, c)
        t = jnp.transpose(t, (0, 3, 1, 2, 4))  # (B, A, Ho, Wo, c)
        return t.reshape(B, A * Ho * Wo, c)

    ret = {
        'box_preds': torch_head_flatten(box, _BOX_CODE_SIZE),
        'cls_preds': torch_head_flatten(cls, num_class),
    }
    if use_direction_classifier:
        dir_ = y[..., n_box + n_cls:]
        ret['dir_cls_preds'] = torch_head_flatten(dir_, num_direction_bins)
    return ret


# ------------------------- pure-JAX reference (NCHW) --------------------------

def reference_forward(x_nchw, params, *, num_class, num_anchor_per_loc,
                      num_direction_bins):
    x = x_nchw.astype(jnp.float32)

    def conv(h, w_hwio, stride):
        return lax.conv_general_dilated(
            h, w_hwio, window_strides=(stride, stride),
            padding=((1, 1), (1, 1)),
            dimension_numbers=('NCHW', 'HWIO', 'NCHW'),
            precision=lax.Precision.HIGHEST)

    def bn_relu(h, s, t):
        return jnp.maximum(h * s[None, :, None, None] + t[None, :, None, None], 0.0)

    h = bn_relu(conv(x, params['w1'], 2), params['s1'], params['t1'])
    h = bn_relu(conv(h, params['w2'], 1), params['s2'], params['t2'])
    h = bn_relu(conv(h, params['w3'], 1), params['s3'], params['t3'])

    def head1x1(w, b):
        y = jnp.einsum('bchw,cd->bdhw', h, w, precision=lax.Precision.HIGHEST)
        return y + b[None, :, None, None]

    def flatten(y, c):
        B, C, H, W = y.shape
        y = y.reshape(B, num_anchor_per_loc, c, H, W)
        y = jnp.transpose(y, (0, 1, 3, 4, 2))
        return y.reshape(B, -1, c)

    return {
        'box_preds': flatten(head1x1(params['w_box'], params['b_box']), _BOX_CODE_SIZE),
        'cls_preds': flatten(head1x1(params['w_cls'], params['b_cls']), num_class),
        'dir_cls_preds': flatten(head1x1(params['w_dir'], params['b_dir']),
                                 num_direction_bins),
    }


# ----------------------------------- main -------------------------------------

if __name__ == "__main__":
    key = jax.random.PRNGKey(0)
    k_x, k_p = jax.random.split(key)

    num_filters = 4
    num_class = 3
    num_anchor_per_loc = 2
    num_direction_bins = 2
    B, H, W = 2, 16, 16

    x = jax.random.normal(k_x, (B, num_filters, H, W), jnp.float32)  # NCHW, as torch
    idx = 0  # unused by forward, mirrored for signature parity

    params = init_params(k_p, num_filters, num_class, num_anchor_per_loc,
                         num_direction_bins, encode_background_as_zeros=True)

    out = large_head_forward(x, idx, params,
                             num_class=num_class,
                             num_anchor_per_loc=num_anchor_per_loc,
                             num_direction_bins=num_direction_bins)
    out = jax.tree.map(jax.block_until_ready, out)

    ref = reference_forward(x, params, num_class=num_class,
                            num_anchor_per_loc=num_anchor_per_loc,
                            num_direction_bins=num_direction_bins)

    M = (H // 2) * (W // 2)
    assert out['box_preds'].shape == (B, num_anchor_per_loc * M, _BOX_CODE_SIZE)
    assert out['cls_preds'].shape == (B, num_anchor_per_loc * M, num_class)
    assert out['dir_cls_preds'].shape == (B, num_anchor_per_loc * M, num_direction_bins)

    # bf16 MXU inputs + f32 accumulation stay well within this tolerance.
    for k in ('box_preds', 'cls_preds', 'dir_cls_preds'):
        np.testing.assert_allclose(np.asarray(out[k]), np.asarray(ref[k]),
                                   rtol=2e-2, atol=2e-2)

    print("KERNEL_OK")
</pallas_src>

<mosaic_0001>
module attributes {stable_mosaic.version = 11 : i64} {
  func.func @_fused_large_head_kernel(%arg0: i32, %arg1: memref<128x36xbf16, #tpu.memory_space<vmem>>, %arg2: memref<36x64xbf16, #tpu.memory_space<vmem>>, %arg3: memref<1x64xf32, #tpu.memory_space<vmem>>, %arg4: memref<1x64xf32, #tpu.memory_space<vmem>>, %arg5: memref<576x64xbf16, #tpu.memory_space<vmem>>, %arg6: memref<1x64xf32, #tpu.memory_space<vmem>>, %arg7: memref<1x64xf32, #tpu.memory_space<vmem>>, %arg8: memref<576x64xbf16, #tpu.memory_space<vmem>>, %arg9: memref<1x64xf32, #tpu.memory_space<vmem>>, %arg10: memref<1x64xf32, #tpu.memory_space<vmem>>, %arg11: memref<64x128xbf16, #tpu.memory_space<vmem>>, %arg12: memref<1x128xf32, #tpu.memory_space<vmem>>, %arg13: memref<128x128xf32, #tpu.memory_space<vmem>>, %arg14: memref<2x10x10x64xf32, #tpu.memory_space<vmem>>, %arg15: memref<128x576xbf16, #tpu.memory_space<vmem>>) attributes {dimension_semantics = [#tpu.dimension_semantics<arbitrary>], iteration_bounds = array<i64: 1>, scalar_prefetch = 0 : i64, scratch_operands = 2 : i64, tpu.core_type = #tpu.core_type<tc>, window_params = [{pipeline_mode = #tpu.pipeline_mode<synchronous>, transform_indices = @transform_0, window_bounds = array<i64: 128, 36>}, {pipeline_mode = #tpu.pipeline_mode<synchronous>, transform_indices = @transform_1, window_bounds = array<i64: 36, 64>}, {pipeline_mode = #tpu.pipeline_mode<synchronous>, transform_indices = @transform_2, window_bounds = array<i64: 1, 64>}, {pipeline_mode = #tpu.pipeline_mode<synchronous>, transform_indices = @transform_3, window_bounds = array<i64: 1, 64>}, {pipeline_mode = #tpu.pipeline_mode<synchronous>, transform_indices = @transform_4, window_bounds = array<i64: 576, 64>}, {pipeline_mode = #tpu.pipeline_mode<synchronous>, transform_indices = @transform_5, window_bounds = array<i64: 1, 64>}, {pipeline_mode = #tpu.pipeline_mode<synchronous>, transform_indices = @transform_6, window_bounds = array<i64: 1, 64>}, {pipeline_mode = #tpu.pipeline_mode<synchronous>, transform_indices = @transform_7, window_bounds = array<i64: 576, 64>}, {pipeline_mode = #tpu.pipeline_mode<synchronous>, transform_indices = @transform_8, window_bounds = array<i64: 1, 64>}, {pipeline_mode = #tpu.pipeline_mode<synchronous>, transform_indices = @transform_9, window_bounds = array<i64: 1, 64>}, {pipeline_mode = #tpu.pipeline_mode<synchronous>, transform_indices = @transform_10, window_bounds = array<i64: 64, 128>}, {pipeline_mode = #tpu.pipeline_mode<synchronous>, transform_indices = @transform_11, window_bounds = array<i64: 1, 128>}, {pipeline_mode = #tpu.pipeline_mode<synchronous>, transform_indices = @transform_12, window_bounds = array<i64: 128, 128>}]} {
    %c0 = arith.constant 0 : index
    %c0_0 = arith.constant 0 : index
    %0 = vector.load %arg1[%c0, %c0_0] : memref<128x36xbf16, #tpu.memory_space<vmem>>, vector<128x36xbf16>
    %c0_1 = arith.constant 0 : index
    %c0_2 = arith.constant 0 : index
    %1 = vector.load %arg2[%c0_1, %c0_2] : memref<36x64xbf16, #tpu.memory_space<vmem>>, vector<36x64xbf16>
    %cst = arith.constant dense<0.000000e+00> : vector<128x64xf32>
    %2 = tpu.matmul %0, %1, %cst {dimension_numbers = #tpu.dot_dimension_numbers<[1], [0], [0], [1], [0, 0, 1, 1], [], []>} : vector<128x36xbf16>, vector<36x64xbf16>, vector<128x64xf32> -> vector<128x64xf32>
    %c0_3 = arith.constant 0 : index
    %c0_4 = arith.constant 0 : index
    %3 = vector.load %arg3[%c0_3, %c0_4] : memref<1x64xf32, #tpu.memory_space<vmem>>, vector<1x64xf32>
    %4 = vector.broadcast %3 : vector<1x64xf32> to vector<128x64xf32>
    %5 = arith.mulf %2, %4 : vector<128x64xf32>
    %c0_5 = arith.constant 0 : index
    %c0_6 = arith.constant 0 : index
    %6 = vector.load %arg4[%c0_5, %c0_6] : memref<1x64xf32, #tpu.memory_space<vmem>>, vector<1x64xf32>
    %7 = vector.broadcast %6 : vector<1x64xf32> to vector<128x64xf32>
    %8 = arith.addf %5, %7 : vector<128x64xf32>
    %cst_7 = arith.constant 0.000000e+00 : f32
    %9 = vector.broadcast %cst_7 : f32 to vector<128x64xf32>
    %10 = arith.maximumf %8, %9 : vector<128x64xf32>
    %cst_8 = arith.constant 0.000000e+00 : f32
    %11 = vector.broadcast %cst_8 : f32 to vector<2x1x10x64xf32>
    %c0_9 = arith.constant 0 : index
    %c0_10 = arith.constant 0 : index
    %c0_11 = arith.constant 0 : index
    %c0_12 = arith.constant 0 : index
    %12 = vector.load %arg14[%c0_9, %c0_10, %c0_11, %c0_12] : memref<2x10x10x64xf32, #tpu.memory_space<vmem>>, vector<2x1x10x64xf32>
    tpu.vector_store %arg14[%c0_9, %c0_10, %c0_11, %c0_12], %11 {strides = array<i32>} : memref<2x10x10x64xf32, #tpu.memory_space<vmem>>, vector<2x1x10x64xf32>,
    %cst_13 = arith.constant 0.000000e+00 : f32
    %13 = vector.broadcast %cst_13 : f32 to vector<2x1x10x64xf32>
    %c0_14 = arith.constant 0 : index
    %c9 = arith.constant 9 : index
    %c0_15 = arith.constant 0 : index
    %c0_16 = arith.constant 0 : index
    %14 = vector.load %arg14[%c0_14, %c9, %c0_15, %c0_16] : memref<2x10x10x64xf32, #tpu.memory_space<vmem>>, vector<2x1x10x64xf32>
    tpu.vector_store %arg14[%c0_14, %c9, %c0_15, %c0_16], %13 {strides = array<i32>} : memref<2x10x10x64xf32, #tpu.memory_space<vmem>>, vector<2x1x10x64xf32>,
    %cst_17 = arith.constant 0.000000e+00 : f32
    %15 = vector.broadcast %cst_17 : f32 to vector<2x10x1x64xf32>
    %c0_18 = arith.constant 0 : index
    %c0_19 = arith.constant 0 : index
    %c0_20 = arith.constant 0 : index
    %c0_21 = arith.constant 0 : index
    %16 = vector.load %arg14[%c0_18, %c0_19, %c0_20, %c0_21] : memref<2x10x10x64xf32, #tpu.memory_space<vmem>>, vector<2x10x1x64xf32>
    tpu.vector_store %arg14[%c0_18, %c0_19, %c0_20, %c0_21], %15 {strides = array<i32>} : memref<2x10x10x64xf32, #tpu.memory_space<vmem>>, vector<2x10x1x64xf32>,
    %cst_22 = arith.constant 0.000000e+00 : f32
    %17 = vector.broadcast %cst_22 : f32 to vector<2x10x1x64xf32>
    %c0_23 = arith.constant 0 : index
    %c0_24 = arith.constant 0 : index
    %c9_25 = arith.constant 9 : index
    %c0_26 = arith.constant 0 : index
    %18 = vector.load %arg14[%c0_23, %c0_24, %c9_25, %c0_26] : memref<2x10x10x64xf32, #tpu.memory_space<vmem>>, vector<2x10x1x64xf32>
    tpu.vector_store %arg14[%c0_23, %c0_24, %c9_25, %c0_26], %17 {strides = array<i32>} : memref<2x10x10x64xf32, #tpu.memory_space<vmem>>, vector<2x10x1x64xf32>,
    %19 = vector.shape_cast %10 : vector<128x64xf32> to vector<2x8x8x64xf32>
    %c0_27 = arith.constant 0 : index
    %c1 = arith.constant 1 : index
    %c1_28 = arith.constant 1 : index
    %c0_29 = arith.constant 0 : index
    %20 = vector.load %arg14[%c0_27, %c1, %c1_28, %c0_29] : memref<2x10x10x64xf32, #tpu.memory_space<vmem>>, vector<2x8x8x64xf32>
    tpu.vector_store %arg14[%c0_27, %c1, %c1_28, %c0_29], %19 {strides = array<i32>} : memref<2x10x10x64xf32, #tpu.memory_space<vmem>>, vector<2x8x8x64xf32>,
    %c0_30 = arith.constant 0 : index
    %c0_31 = arith.constant 0 : index
    %c0_32 = arith.constant 0 : index
    %c0_33 = arith.constant 0 : index
    %21 = vector.load %arg14[%c0_30, %c0_31, %c0_32, %c0_33] : memref<2x10x10x64xf32, #tpu.memory_space<vmem>>, vector<2x8x8x64xf32>
    %22 = vector.shape_cast %21 : vector<2x8x8x64xf32> to vector<128x64xf32>
    %23 = arith.truncf %22 : vector<128x64xf32> to vector<128x64xbf16>
    %c0_34 = arith.constant 0 : index
    %c0_35 = arith.constant 0 : index
    %c1_36 = arith.constant 1 : index
    %c0_37 = arith.constant 0 : index
    %24 = vector.load %arg14[%c0_34, %c0_35, %c1_36, %c0_37] : memref<2x10x10x64xf32, #tpu.memory_space<vmem>>, vector<2x8x8x64xf32>
    %25 = vector.shape_cast %24 : vector<2x8x8x64xf32> to vector<128x64xf32>
    %26 = arith.truncf %25 : vector<128x64xf32> to vector<128x64xbf16>
    %27 = tpu.concatenate %23, %26 in 1 : vector<128x64xbf16>, vector<128x64xbf16> -> vector<128x128xbf16>
    %c0_38 = arith.constant 0 : index
    %c0_39 = arith.constant 0 : index
    %28 = vector.load %arg15[%c0_38, %c0_39] : memref<128x576xbf16, #tpu.memory_space<vmem>>, vector<128x128xbf16>
    tpu.vector_store %arg15[%c0_38, %c0_39], %27 {strides = array<i32>} : memref<128x576xbf16, #tpu.memory_space<vmem>>, vector<128x128xbf16>,
    %c0_40 = arith.constant 0 : index
    %c0_41 = arith.constant 0 : index
    %c2 = arith.constant 2 : index
    %c0_42 = arith.constant 0 : index
    %29 = vector.load %arg14[%c0_40, %c0_41, %c2, %c0_42] : memref<2x10x10x64xf32, #tpu.memory_space<vmem>>, vector<2x8x8x64xf32>
    %30 = vector.shape_cast %29 : vector<2x8x8x64xf32> to vector<128x64xf32>
    %31 = arith.truncf %30 : vector<128x64xf32> to vector<128x64xbf16>
    %c0_43 = arith.constant 0 : index
    %c1_44 = arith.constant 1 : index
    %c0_45 = arith.constant 0 : index
    %c0_46 = arith.constant 0 : index
    %32 = vector.load %arg14[%c0_43, %c1_44, %c0_45, %c0_46] : memref<2x10x10x64xf32, #tpu.memory_space<vmem>>, vector<2x8x8x64xf32>
    %33 = vector.shape_cast %32 : vector<2x8x8x64xf32> to vector<128x64xf32>
    %34 = arith.truncf %33 : vector<128x64xf32> to vector<128x64xbf16>
    %35 = tpu.concatenate %31, %34 in 1 : vector<128x64xbf16>, vector<128x64xbf16> -> vector<128x128xbf16>
    %c0_47 = arith.constant 0 : index
    %c128 = arith.constant 128 : index
    %36 = vector.load %arg15[%c0_47, %c128] : memref<128x576xbf16, #tpu.memory_space<vmem>>, vector<128x128xbf16>
    tpu.vector_store %arg15[%c0_47, %c128], %35 {strides = array<i32>} : memref<128x576xbf16, #tpu.memory_space<vmem>>, vector<128x128xbf16>,
    %c0_48 = arith.constant 0 : index
    %c1_49 = arith.constant 1 : index
    %c1_50 = arith.constant 1 : index
    %c0_51 = arith.constant 0 : index
    %37 = vector.load %arg14[%c0_48, %c1_49, %c1_50, %c0_51] : memref<2x10x10x64xf32, #tpu.memory_space<vmem>>, vector<2x8x8x64xf32>
    %38 = vector.shape_cast %37 : vector<2x8x8x64xf32> to vector<128x64xf32>
    %39 = arith.truncf %38 : vector<128x64xf32> to vector<128x64xbf16>
    %c0_52 = arith.constant 0 : index
    %c1_53 = arith.constant 1 : index
    %c2_54 = arith.constant 2 : index
    %c0_55 = arith.constant 0 : index
    %40 = vector.load %arg14[%c0_52, %c1_53, %c2_54, %c0_55] : memref<2x10x10x64xf32, #tpu.memory_space<vmem>>, vector<2x8x8x64xf32>
    %41 = vector.shape_cast %40 : vector<2x8x8x64xf32> to vector<128x64xf32>
    %42 = arith.truncf %41 : vector<128x64xf32> to vector<128x64xbf16>
    %43 = tpu.concatenate %39, %42 in 1 : vector<128x64xbf16>, vector<128x64xbf16> -> vector<128x128xbf16>
    %c0_56 = arith.constant 0 : index
    %c256 = arith.constant 256 : index
    %44 = vector.load %arg15[%c0_56, %c256] : memref<128x576xbf16, #tpu.memory_space<vmem>>, vector<128x128xbf16>
    tpu.vector_store %arg15[%c0_56, %c256], %43 {strides = array<i32>} : memref<128x576xbf16, #tpu.memory_space<vmem>>, vector<128x128xbf16>,
    %c0_57 = arith.constant 0 : index
    %c2_58 = arith.constant 2 : index
    %c0_59 = arith.constant 0 : index
    %c0_60 = arith.constant 0 : index
    %45 = vector.load %arg14[%c0_57, %c2_58, %c0_59, %c0_60] : memref<2x10x10x64xf32, #tpu.memory_space<vmem>>, vector<2x8x8x64xf32>
    %46 = vector.shape_cast %45 : vector<2x8x8x64xf32> to vector<128x64xf32>
    %47 = arith.truncf %46 : vector<128x64xf32> to vector<128x64xbf16>
    %c0_61 = arith.constant 0 : index
    %c2_62 = arith.constant 2 : index
    %c1_63 = arith.constant 1 : index
    %c0_64 = arith.constant 0 : index
    %48 = vector.load %arg14[%c0_61, %c2_62, %c1_63, %c0_64] : memref<2x10x10x64xf32, #tpu.memory_space<vmem>>, vector<2x8x8x64xf32>
    %49 = vector.shape_cast %48 : vector<2x8x8x64xf32> to vector<128x64xf32>
    %50 = arith.truncf %49 : vector<128x64xf32> to vector<128x64xbf16>
    %51 = tpu.concatenate %47, %50 in 1 : vector<128x64xbf16>, vector<128x64xbf16> -> vector<128x128xbf16>
    %c0_65 = arith.constant 0 : index
    %c384 = arith.constant 384 : index
    %52 = vector.load %arg15[%c0_65, %c384] : memref<128x576xbf16, #tpu.memory_space<vmem>>, vector<128x128xbf16>
    tpu.vector_store %arg15[%c0_65, %c384], %51 {strides = array<i32>} : memref<128x576xbf16, #tpu.memory_space<vmem>>, vector<128x128xbf16>,
    %c0_66 = arith.constant 0 : index
    %c2_67 = arith.constant 2 : index
    %c2_68 = arith.constant 2 : index
    %c0_69 = arith.constant 0 : index
    %53 = vector.load %arg14[%c0_66, %c2_67, %c2_68, %c0_69] : memref<2x10x10x64xf32, #tpu.memory_space<vmem>>, vector<2x8x8x64xf32>
    %54 = vector.shape_cast %53 : vector<2x8x8x64xf32> to vector<128x64xf32>
    %55 = arith.truncf %54 : vector<128x64xf32> to vector<128x64xbf16>
    %c0_70 = arith.constant 0 : index
    %c512 = arith.constant 512 : index
    %56 = vector.load %arg15[%c0_70, %c512] : memref<128x576xbf16, #tpu.memory_space<vmem>>, vector<128x64xbf16>
    tpu.vector_store %arg15[%c0_70, %c512], %55 {strides = array<i32>} : memref<128x576xbf16, #tpu.memory_space<vmem>>, vector<128x64xbf16>,
    %c0_71 = arith.constant 0 : index
    %c0_72 = arith.constant 0 : index
    %57 = vector.load %arg15[%c0_71, %c0_72] : memref<128x576xbf16, #tpu.memory_space<vmem>>, vector<128x576xbf16>
    %c0_73 = arith.constant 0 : index
    %c0_74 = arith.constant 0 : index
    %58 = vector.load %arg5[%c0_73, %c0_74] : memref<576x64xbf16, #tpu.memory_space<vmem>>, vector<576x64xbf16>
    %cst_75 = arith.constant dense<0.000000e+00> : vector<128x64xf32>
    %59 = tpu.matmul %57, %58, %cst_75 {dimension_numbers = #tpu.dot_dimension_numbers<[1], [0], [0], [1], [0, 0, 1, 1], [], []>} : vector<128x576xbf16>, vector<576x64xbf16>, vector<128x64xf32> -> vector<128x64xf32>
    %c0_76 = arith.constant 0 : index
    %c0_77 = arith.constant 0 : index
    %60 = vector.load %arg6[%c0_76, %c0_77] : memref<1x64xf32, #tpu.memory_space<vmem>>, vector<1x64xf32>
    %61 = vector.broadcast %60 : vector<1x64xf32> to vector<128x64xf32>
    %62 = arith.mulf %59, %61 : vector<128x64xf32>
    %c0_78 = arith.constant 0 : index
    %c0_79 = arith.constant 0 : index
    %63 = vector.load %arg7[%c0_78, %c0_79] : memref<1x64xf32, #tpu.memory_space<vmem>>, vector<1x64xf32>
    %64 = vector.broadcast %63 : vector<1x64xf32> to vector<128x64xf32>
    %65 = arith.addf %62, %64 : vector<128x64xf32>
    %cst_80 = arith.constant 0.000000e+00 : f32
    %66 = vector.broadcast %cst_80 : f32 to vector<128x64xf32>
    %67 = arith.maximumf %65, %66 : vector<128x64xf32>
    %68 = vector.shape_cast %67 : vector<128x64xf32> to vector<2x8x8x64xf32>
    %c0_81 = arith.constant 0 : index
    %c1_82 = arith.constant 1 : index
    %c1_83 = arith.constant 1 : index
    %c0_84 = arith.constant 0 : index
    %69 = vector.load %arg14[%c0_81, %c1_82, %c1_83, %c0_84] : memref<2x10x10x64xf32, #tpu.memory_space<vmem>>, vector<2x8x8x64xf32>
    tpu.vector_store %arg14[%c0_81, %c1_82, %c1_83, %c0_84], %68 {strides = array<i32>} : memref<2x10x10x64xf32, #tpu.memory_space<vmem>>, vector<2x8x8x64xf32>,
    %c0_85 = arith.constant 0 : index
    %c0_86 = arith.constant 0 : index
    %c0_87 = arith.constant 0 : index
    %c0_88 = arith.constant 0 : index
    %70 = vector.load %arg14[%c0_85, %c0_86, %c0_87, %c0_88] : memref<2x10x10x64xf32, #tpu.memory_space<vmem>>, vector<2x8x8x64xf32>
    %71 = vector.shape_cast %70 : vector<2x8x8x64xf32> to vector<128x64xf32>
    %72 = arith.truncf %71 : vector<128x64xf32> to vector<128x64xbf16>
    %c0_89 = arith.constant 0 : index
    %c0_90 = arith.constant 0 : index
    %c1_91 = arith.constant 1 : index
    %c0_92 = arith.constant 0 : index
    %73 = vector.load %arg14[%c0_89, %c0_90, %c1_91, %c0_92] : memref<2x10x10x64xf32, #tpu.memory_space<vmem>>, vector<2x8x8x64xf32>
    %74 = vector.shape_cast %73 : vector<2x8x8x64xf32> to vector<128x64xf32>
    %75 = arith.truncf %74 : vector<128x64xf32> to vector<128x64xbf16>
    %76 = tpu.concatenate %72, %75 in 1 : vector<128x64xbf16>, vector<128x64xbf16> -> vector<128x128xbf16>
    %c0_93 = arith.constant 0 : index
    %c0_94 = arith.constant 0 : index
    %77 = vector.load %arg15[%c0_93, %c0_94] : memref<128x576xbf16, #tpu.memory_space<vmem>>, vector<128x128xbf16>
    tpu.vector_store %arg15[%c0_93, %c0_94], %76 {strides = array<i32>} : memref<128x576xbf16, #tpu.memory_space<vmem>>, vector<128x128xbf16>,
    %c0_95 = arith.constant 0 : index
    %c0_96 = arith.constant 0 : index
    %c2_97 = arith.constant 2 : index
    %c0_98 = arith.constant 0 : index
    %78 = vector.load %arg14[%c0_95, %c0_96, %c2_97, %c0_98] : memref<2x10x10x64xf32, #tpu.memory_space<vmem>>, vector<2x8x8x64xf32>
    %79 = vector.shape_cast %78 : vector<2x8x8x64xf32> to vector<128x64xf32>
    %80 = arith.truncf %79 : vector<128x64xf32> to vector<128x64xbf16>
    %c0_99 = arith.constant 0 : index
    %c1_100 = arith.constant 1 : index
    %c0_101 = arith.constant 0 : index
    %c0_102 = arith.constant 0 : index
    %81 = vector.load %arg14[%c0_99, %c1_100, %c0_101, %c0_102] : memref<2x10x10x64xf32, #tpu.memory_space<vmem>>, vector<2x8x8x64xf32>
    %82 = vector.shape_cast %81 : vector<2x8x8x64xf32> to vector<128x64xf32>
    %83 = arith.truncf %82 : vector<128x64xf32> to vector<128x64xbf16>
    %84 = tpu.concatenate %80, %83 in 1 : vector<128x64xbf16>, vector<128x64xbf16> -> vector<128x128xbf16>
    %c0_103 = arith.constant 0 : index
    %c128_104 = arith.constant 128 : index
    %85 = vector.load %arg15[%c0_103, %c128_104] : memref<128x576xbf16, #tpu.memory_space<vmem>>, vector<128x128xbf16>
    tpu.vector_store %arg15[%c0_103, %c128_104], %84 {strides = array<i32>} : memref<128x576xbf16, #tpu.memory_space<vmem>>, vector<128x128xbf16>,
    %c0_105 = arith.constant 0 : index
    %c1_106 = arith.constant 1 : index
    %c1_107 = arith.constant 1 : index
    %c0_108 = arith.constant 0 : index
    %86 = vector.load %arg14[%c0_105, %c1_106, %c1_107, %c0_108] : memref<2x10x10x64xf32, #tpu.memory_space<vmem>>, vector<2x8x8x64xf32>
    %87 = vector.shape_cast %86 : vector<2x8x8x64xf32> to vector<128x64xf32>
    %88 = arith.truncf %87 : vector<128x64xf32> to vector<128x64xbf16>
    %c0_109 = arith.constant 0 : index
    %c1_110 = arith.constant 1 : index
    %c2_111 = arith.constant 2 : index
    %c0_112 = arith.constant 0 : index
    %89 = vector.load %arg14[%c0_109, %c1_110, %c2_111, %c0_112] : memref<2x10x10x64xf32, #tpu.memory_space<vmem>>, vector<2x8x8x64xf32>
    %90 = vector.shape_cast %89 : vector<2x8x8x64xf32> to vector<128x64xf32>
    %91 = arith.truncf %90 : vector<128x64xf32> to vector<128x64xbf16>
    %92 = tpu.concatenate %88, %91 in 1 : vector<128x64xbf16>, vector<128x64xbf16> -> vector<128x128xbf16>
    %c0_113 = arith.constant 0 : index
    %c256_114 = arith.constant 256 : index
    %93 = vector.load %arg15[%c0_113, %c256_114] : memref<128x576xbf16, #tpu.memory_space<vmem>>, vector<128x128xbf16>
    tpu.vector_store %arg15[%c0_113, %c256_114], %92 {strides = array<i32>} : memref<128x576xbf16, #tpu.memory_space<vmem>>, vector<128x128xbf16>,
    %c0_115 = arith.constant 0 : index
    %c2_116 = arith.constant 2 : index
    %c0_117 = arith.constant 0 : index
    %c0_118 = arith.constant 0 : index
    %94 = vector.load %arg14[%c0_115, %c2_116, %c0_117, %c0_118] : memref<2x10x10x64xf32, #tpu.memory_space<vmem>>, vector<2x8x8x64xf32>
    %95 = vector.shape_cast %94 : vector<2x8x8x64xf32> to vector<128x64xf32>
    %96 = arith.truncf %95 : vector<128x64xf32> to vector<128x64xbf16>
    %c0_119 = arith.constant 0 : index
    %c2_120 = arith.constant 2 : index
    %c1_121 = arith.constant 1 : index
    %c0_122 = arith.constant 0 : index
    %97 = vector.load %arg14[%c0_119, %c2_120, %c1_121, %c0_122] : memref<2x10x10x64xf32, #tpu.memory_space<vmem>>, vector<2x8x8x64xf32>
    %98 = vector.shape_cast %97 : vector<2x8x8x64xf32> to vector<128x64xf32>
    %99 = arith.truncf %98 : vector<128x64xf32> to vector<128x64xbf16>
    %100 = tpu.concatenate %96, %99 in 1 : vector<128x64xbf16>, vector<128x64xbf16> -> vector<128x128xbf16>
    %c0_123 = arith.constant 0 : index
    %c384_124 = arith.constant 384 : index
    %101 = vector.load %arg15[%c0_123, %c384_124] : memref<128x576xbf16, #tpu.memory_space<vmem>>, vector<128x128xbf16>
    tpu.vector_store %arg15[%c0_123, %c384_124], %100 {strides = array<i32>} : memref<128x576xbf16, #tpu.memory_space<vmem>>, vector<128x128xbf16>,
    %c0_125 = arith.constant 0 : index
    %c2_126 = arith.constant 2 : index
    %c2_127 = arith.constant 2 : index
    %c0_128 = arith.constant 0 : index
    %102 = vector.load %arg14[%c0_125, %c2_126, %c2_127, %c0_128] : memref<2x10x10x64xf32, #tpu.memory_space<vmem>>, vector<2x8x8x64xf32>
    %103 = vector.shape_cast %102 : vector<2x8x8x64xf32> to vector<128x64xf32>
    %104 = arith.truncf %103 : vector<128x64xf32> to vector<128x64xbf16>
    %c0_129 = arith.constant 0 : index
    %c512_130 = arith.constant 512 : index
    %105 = vector.load %arg15[%c0_129, %c512_130] : memref<128x576xbf16, #tpu.memory_space<vmem>>, vector<128x64xbf16>
    tpu.vector_store %arg15[%c0_129, %c512_130], %104 {strides = array<i32>} : memref<128x576xbf16, #tpu.memory_space<vmem>>, vector<128x64xbf16>,
    %c0_131 = arith.constant 0 : index
    %c0_132 = arith.constant 0 : index
    %106 = vector.load %arg15[%c0_131, %c0_132] : memref<128x576xbf16, #tpu.memory_space<vmem>>, vector<128x576xbf16>
    %c0_133 = arith.constant 0 : index
    %c0_134 = arith.constant 0 : index
    %107 = vector.load %arg8[%c0_133, %c0_134] : memref<576x64xbf16, #tpu.memory_space<vmem>>, vector<576x64xbf16>
    %cst_135 = arith.constant dense<0.000000e+00> : vector<128x64xf32>
    %108 = tpu.matmul %106, %107, %cst_135 {dimension_numbers = #tpu.dot_dimension_numbers<[1], [0], [0], [1], [0, 0, 1, 1], [], []>} : vector<128x576xbf16>, vector<576x64xbf16>, vector<128x64xf32> -> vector<128x64xf32>
    %c0_136 = arith.constant 0 : index
    %c0_137 = arith.constant 0 : index
    %109 = vector.load %arg9[%c0_136, %c0_137] : memref<1x64xf32, #tpu.memory_space<vmem>>, vector<1x64xf32>
    %110 = vector.broadcast %109 : vector<1x64xf32> to vector<128x64xf32>
    %111 = arith.mulf %108, %110 : vector<128x64xf32>
    %c0_138 = arith.constant 0 : index
    %c0_139 = arith.constant 0 : index
    %112 = vector.load %arg10[%c0_138, %c0_139] : memref<1x64xf32, #tpu.memory_space<vmem>>, vector<1x64xf32>
    %113 = vector.broadcast %112 : vector<1x64xf32> to vector<128x64xf32>
    %114 = arith.addf %111, %113 : vector<128x64xf32>
    %cst_140 = arith.constant 0.000000e+00 : f32
    %115 = vector.broadcast %cst_140 : f32 to vector<128x64xf32>
    %116 = arith.maximumf %114, %115 : vector<128x64xf32>
    %117 = arith.truncf %116 : vector<128x64xf32> to vector<128x64xbf16>
    %c0_141 = arith.constant 0 : index
    %c0_142 = arith.constant 0 : index
    %118 = vector.load %arg11[%c0_141, %c0_142] : memref<64x128xbf16, #tpu.memory_space<vmem>>, vector<64x128xbf16>
    %cst_143 = arith.constant dense<0.000000e+00> : vector<128x128xf32>
    %119 = tpu.matmul %117, %118, %cst_143 {dimension_numbers = #tpu.dot_dimension_numbers<[1], [0], [0], [1], [0, 0, 1, 1], [], []>} : vector<128x64xbf16>, vector<64x128xbf16>, vector<128x128xf32> -> vector<128x128xf32>
    %c0_144 = arith.constant 0 : index
    %c0_145 = arith.constant 0 : index
    %120 = vector.load %arg12[%c0_144, %c0_145] : memref<1x128xf32, #tpu.memory_space<vmem>>, vector<1x128xf32>
    %121 = vector.broadcast %120 : vector<1x128xf32> to vector<128x128xf32>
    %122 = arith.addf %119, %121 : vector<128x128xf32>
    %c0_146 = arith.constant 0 : index
    %c0_147 = arith.constant 0 : index
    %123 = vector.load %arg13[%c0_146, %c0_147] : memref<128x128xf32, #tpu.memory_space<vmem>>, vector<128x128xf32>
    tpu.vector_store %arg13[%c0_146, %c0_147], %122 {strides = array<i32>} : memref<128x128xf32, #tpu.memory_space<vmem>>, vector<128x128xf32>,
    return
  }
  func.func @transform_0(%arg0: i32) -> (i32, i32) {
    %c0_i32 = arith.constant 0 : i32
    %c0_i32_0 = arith.constant 0 : i32
    %c0_i32_1 = arith.constant 0 : i32
    return %c0_i32, %c0_i32_0 : i32, i32
  }
  func.func @transform_1(%arg0: i32) -> (i32, i32) {
    %c0_i32 = arith.constant 0 : i32
    %c0_i32_0 = arith.constant 0 : i32
    %c0_i32_1 = arith.constant 0 : i32
    return %c0_i32, %c0_i32_0 : i32, i32
  }
  func.func @transform_2(%arg0: i32) -> (i32, i32) {
    %c0_i32 = arith.constant 0 : i32
    %c0_i32_0 = arith.constant 0 : i32
    %c0_i32_1 = arith.constant 0 : i32
    return %c0_i32, %c0_i32_0 : i32, i32
  }
  func.func @transform_3(%arg0: i32) -> (i32, i32) {
    %c0_i32 = arith.constant 0 : i32
    %c0_i32_0 = arith.constant 0 : i32
    %c0_i32_1 = arith.constant 0 : i32
    return %c0_i32, %c0_i32_0 : i32, i32
  }
  func.func @transform_4(%arg0: i32) -> (i32, i32) {
    %c0_i32 = arith.constant 0 : i32
    %c0_i32_0 = arith.constant 0 : i32
    %c0_i32_1 = arith.constant 0 : i32
    return %c0_i32, %c0_i32_0 : i32, i32
  }
  func.func @transform_5(%arg0: i32) -> (i32, i32) {
    %c0_i32 = arith.constant 0 : i32
    %c0_i32_0 = arith.constant 0 : i32
    %c0_i32_1 = arith.constant 0 : i32
    return %c0_i32, %c0_i32_0 : i32, i32
  }
  func.func @transform_6(%arg0: i32) -> (i32, i32) {
    %c0_i32 = arith.constant 0 : i32
    %c0_i32_0 = arith.constant 0 : i32
    %c0_i32_1 = arith.constant 0 : i32
    return %c0_i32, %c0_i32_0 : i32, i32
  }
  func.func @transform_7(%arg0: i32) -> (i32, i32) {
    %c0_i32 = arith.constant 0 : i32
    %c0_i32_0 = arith.constant 0 : i32
    %c0_i32_1 = arith.constant 0 : i32
    return %c0_i32, %c0_i32_0 : i32, i32
  }
  func.func @transform_8(%arg0: i32) -> (i32, i32) {
    %c0_i32 = arith.constant 0 : i32
    %c0_i32_0 = arith.constant 0 : i32
    %c0_i32_1 = arith.constant 0 : i32
    return %c0_i32, %c0_i32_0 : i32, i32
  }
  func.func @transform_9(%arg0: i32) -> (i32, i32) {
    %c0_i32 = arith.constant 0 : i32
    %c0_i32_0 = arith.constant 0 : i32
    %c0_i32_1 = arith.constant 0 : i32
    return %c0_i32, %c0_i32_0 : i32, i32
  }
  func.func @transform_10(%arg0: i32) -> (i32, i32) {
    %c0_i32 = arith.constant 0 : i32
    %c0_i32_0 = arith.constant 0 : i32
    %c0_i32_1 = arith.constant 0 : i32
    return %c0_i32, %c0_i32_0 : i32, i32
  }
  func.func @transform_11(%arg0: i32) -> (i32, i32) {
    %c0_i32 = arith.constant 0 : i32
    %c0_i32_0 = arith.constant 0 : i32
    %c0_i32_1 = arith.constant 0 : i32
    return %c0_i32, %c0_i32_0 : i32, i32
  }
  func.func @transform_12(%arg0: i32) -> (i32, i32) {
    %c0_i32 = arith.constant 0 : i32
    %c0_i32_0 = arith.constant 0 : i32
    %c0_i32_1 = arith.constant 0 : i32
    return %c0_i32, %c0_i32_0 : i32, i32
  }
}

</mosaic_0001>

<bundles_post_ra>
// kernel: tpu_custom_call.1
= control target key start
LH: loop header
LB: loop body
LE: loop exit
PB: predicated region body
PF: predicated region fallthrough
CT: control target
= control target key end

     0   :  { %vm119_vm0 = vcmask 293888   ;;  %vm144_vm1 = vcmask 1041408   ;;  %s4861_s0 = inlined_call_operand.vmem [shape: bf16[128,36], index: 0, kind: input, shape index: {}]   ;;  %s4862_s1 = inlined_call_operand.vmem [shape: bf16[36,64], index: 1, kind: input, shape index: {}]   ;;  %s4863_s2 = inlined_call_operand.vmem [shape: f32[1,64], index: 2, kind: input, shape index: {}]   ;;  %s4864_s3 = inlined_call_operand.vmem [shape: f32[1,64], index: 3, kind: input, shape index: {}]   ;;  %s4865_s4 = inlined_call_operand.vmem [shape: bf16[576,64], index: 4, kind: input, shape index: {}]   ;;  %s4866_s5 = inlined_call_operand.vmem [shape: f32[1,64], index: 5, kind: input, shape index: {}]   ;;  %s4867_s6 = inlined_call_operand.vmem [shape: f32[1,64], index: 6, kind: input, shape index: {}]   ;;  %s4868_s7 = inlined_call_operand.vmem [shape: bf16[576,64], index: 7, kind: input, shape index: {}]   ;;  %s4869_s8 = inlined_call_operand.vmem [shape: f32[1,64], index: 8, kind: input, shape index: {}]   ;;  %s4870_s9 = inlined_call_operand.vmem [shape: f32[1,64], index: 9, kind: input, shape index: {}]   ;;  %s4871_s10 = inlined_call_operand.vmem [shape: bf16[64,128], index: 10, kind: input, shape index: {}]   ;;  %s4872_s11 = inlined_call_operand.vmem [shape: f32[1,128], index: 11, kind: input, shape index: {}]   ;;  %s4873_s12 = inlined_call_operand.hbm [shape: f32[128,128], index: 12, kind: output, shape index: {}]  }
   0x1   :  { %v3500_v0 = vld [vmem:[%s4862_s1] sm:$0xff]   ;;  %v3501_v1 = vld [vmem:[%s4862_s1 + $0x8] sm:$0xff]   ;;  %v3502_v2 = vld [vmem:[%s4862_s1 + $0x10] ss:$0 sps:$4 sm:$0x33]  }
   0x2   :  { %3392 = vmatprep.subr.bf16.mxu0 %v3500_v0  ;;  %v3503_v3 = vld [vmem:[%s4861_s0] sm:$0xff]   ;;  %v146_v4 = vsel %vm144_vm1, %v3502_v2, 0  ;;  %v3504_v5 = vld [vmem:[%s4861_s0 + $0x8] sm:$0xff]   ;;  %v3505_v6 = vld [vmem:[%s4861_s0 + $0x10] sm:$0xff]  }
   0x3   :  { %3393 = vmatpush3.bf16.msra.mxu0 %v3500_v0  ;;  %3398 = vmatprep.mubr.msk.bf16.mxu0 %vm119_vm0, %v3503_v3  ;;  %v3506_v7 = vld [vmem:[%s4861_s0 + $0x18] sm:$0xff]   ;;  %v3507_v8 = vld [vmem:[%s4861_s0 + $0x20] sm:$0xff]   ;;  %v3508_v9 = vld [vmem:[%s4861_s0 + $0x28] sm:$0xff]  }
   0x4   :  { %3394 = vmatprep.subr.bf16.mxu0 %v3501_v1  ;;  %v3509_v10 = vld [vmem:[%s4861_s0 + $0x30] sm:$0xff]   ;;  %v3510_v11 = vld [vmem:[%s4861_s0 + $0x38] sm:$0xff]  }
   0x7   :  { %3395 = vmatpush3.bf16.msra.mxu0 %v3501_v1 }
   0x8   :  { %3494 = vmatprep.subr.msk.bf16.mxu0 %vm144_vm1, %v3502_v2 }
   0xb   :  { %3397 = vmatpush3.bf16.msra.mxu0 %v146_v4 }
   0xe   :  { %3399 = vmatmul.mubr.msk.bf16.vlgmr.msra.gmra.mrb[0].mxu0 %vm119_vm0, %v3504_v5 }
   0xf   :  { %3402 = vmatprep.mubr.msk.bf16.mxu0 %vm119_vm0, %v3505_v6 }
  0x16   :  { %3403 = vmatmul.mubr.msk.bf16.gmra.mrb[4].mxu0 %vm119_vm0, %v3506_v7 }
  0x17   :  { %3406 = vmatprep.mubr.msk.bf16.mxu0 %vm119_vm0, %v3507_v8 }
  0x1e   :  { %3407 = vmatmul.mubr.msk.bf16.gmra.mrb[8].mxu0 %vm119_vm0, %v3508_v9 }
  0x1f   :  { %3410 = vmatprep.mubr.msk.bf16.mxu0 %vm119_vm0, %v3509_v10 }
  0x26   :  { %3411 = vmatmul.mubr.msk.bf16.gmra.mrb[12].mxu0 %vm119_vm0, %v3510_v11 }
  0x27   :  { %17 = vsyncpa [#allocation5], 0  ;;  %vm307_vm2 = vcmask 523264   ;;  %vm318_vm3 = vcmask 516096   ;;  %v3611_v12 = vmov 0.0   ;;  %vm309_vm4 = vcmask 517120  }
  0x28   :  { %342 = vst.msk [vmem:[#allocation2 + $0x39] sm:$0x1] %vm318_vm3, %v3611_v12  ;;  %320 = vst.msk [vmem:[#allocation2 + $0x10] sm:$0x1] %vm318_vm3, %v3611_v12  ;;  %v3511_v13 = vld [vmem:[%s4865_s4 + $0x40] sm:$0xff]   ;;  %v3513_v15 = vld [vmem:[%s4865_s4 + $0x48] sm:$0xff]  }
  0x29   :  { %308 = vst.msk [vmem:[#allocation2] sm:$0xff] %vm307_vm2, %v3611_v12  ;;  %311 = vst.msk [vmem:[#allocation2 + $0xa0] sm:$0xff] %vm307_vm2, %v3611_v12  ;;  %v3512_v14 = vld [vmem:[%s4865_s4] sm:$0xff]   ;;  %3100 = vmatprep.subr.bf16.mxu1 %v3511_v13  ;;  %v3514_v16 = vld [vmem:[%s4865_s4 + $0x8] sm:$0xff]   ;;  %s3612_s29 = smov 64  }
  0x2a   :  { %314 = vst.msk [vmem:[#allocation2 + $0x90] sm:$0xff] %vm307_vm2, %v3611_v12  ;;  %316 = vst.msk [vmem:[#allocation2 + $0x130] sm:$0xff] %vm307_vm2, %v3611_v12  ;;  %3101 = vmatpush3.bf16.msra.mxu1 %v3512_v14  ;;  %v3515_v17 = vld [vmem:[%s4865_s4 + $0x50] sm:$0xff]   ;;  %v3517_v19 = vld [vmem:[%s4865_s4 + $0x58] sm:$0xff]  }
  0x2b   :  { %321 = vst.msk [vmem:[#allocation2 + $0x20] sm:$0x1] %vm318_vm3, %v3611_v12  ;;  %322 = vst.msk [vmem:[#allocation2 + $0x30] sm:$0x1] %vm318_vm3, %v3611_v12  ;;  %3102 = vmatprep.subr.bf16.mxu1 %v3513_v15  ;;  %v3516_v18 = vld [vmem:[%s4865_s4 + $0x10] sm:$0xff]   ;;  %v3518_v20 = vld [vmem:[%s4865_s4 + $0x18] sm:$0xff]  }
  0x2c   :  { %323 = vst.msk [vmem:[#allocation2 + $0x40] sm:$0x1] %vm318_vm3, %v3611_v12  ;;  %324 = vst.msk [vmem:[#allocation2 + $0x50] sm:$0x1] %vm318_vm3, %v3611_v12  ;;  %v3519_v21 = vld [vmem:[%s4865_s4 + $0x60] sm:$0xff]   ;;  %v3521_v24 = vld [vmem:[%s4865_s4 + $0x68] sm:$0xff]  }
  0x2d   :  { %325 = vst.msk [vmem:[#allocation2 + $0x60] sm:$0x1] %vm318_vm3, %v3611_v12  ;;  %326 = vst.msk [vmem:[#allocation2 + $0x70] sm:$0x1] %vm318_vm3, %v3611_v12  ;;  %v3520_v22 = vld [vmem:[%s4865_s4 + $0x20] sm:$0xff]   ;;  %v3522_v27 = vld [vmem:[%s4865_s4 + $0x28] sm:$0xff]  }
  0x2e   :  { %327 = vst.msk [vmem:[#allocation2 + $0x80] sm:$0x1] %vm318_vm3, %v3611_v12  ;;  %330 = vst.msk [vmem:[#allocation2 + $0xb0] sm:$0x1] %vm318_vm3, %v3611_v12  ;;  %3103 = vmatpush3.bf16.msra.mxu1 %v3514_v16  ;;  %v3799_v23 = vld [vmem:[%s4863_s2] ss:$0 sm:$0xff] }
  0x2f   :  { %331 = vst.msk [vmem:[#allocation2 + $0xc0] sm:$0x1] %vm318_vm3, %v3611_v12  ;;  %332 = vst.msk [vmem:[#allocation2 + $0xd0] sm:$0x1] %vm318_vm3, %v3611_v12  ;;  %3104 = vmatprep.subr.bf16.mxu1 %v3515_v17  ;;  %v3807_v26 = vld [vmem:[%s4864_s3] ss:$0 sm:$0xff] }
  0x30   :  { %333 = vst.msk [vmem:[#allocation2 + $0xe0] sm:$0x1] %vm318_vm3, %v3611_v12  ;;  %334 = vst.msk [vmem:[#allocation2 + $0xf0] sm:$0x1] %vm318_vm3, %v3611_v12  ;;  %v3523_v35 = vld [vmem:[%s4865_s4 + $0x70] sm:$0xff]   ;;  %v3525_v44 = vld [vmem:[%s4865_s4 + $0x78] sm:$0xff]  }
  0x31   :  { %335 = vst.msk [vmem:[#allocation2 + $0x100] sm:$0x1] %vm318_vm3, %v3611_v12  ;;  %336 = vst.msk [vmem:[#allocation2 + $0x110] sm:$0x1] %vm318_vm3, %v3611_v12  ;;  %v3524_v38 = vld [vmem:[%s4865_s4 + $0x30] sm:$0xff]   ;;  %v3526_v47 = vld [vmem:[%s4865_s4 + $0x38] sm:$0xff]  }
  0x32   :  { %337 = vst.msk [vmem:[#allocation2 + $0x120] sm:$0x1] %vm318_vm3, %v3611_v12  ;;  %340 = vst.msk [vmem:[#allocation2 + $0x19] sm:$0x1] %vm318_vm3, %v3611_v12  ;;  %3105 = vmatpush3.bf16.msra.mxu1 %v3516_v18  ;;  %v3527_v48 = vld [vmem:[%s4865_s4 + $0xc0] sm:$0xff]   ;;  %v3530_v59 = vld [vmem:[%s4865_s4 + $0xc8] sm:$0xff]  }
  0x33   :  { %341 = vst.msk [vmem:[#allocation2 + $0x29] sm:$0x1] %vm318_vm3, %v3611_v12  ;;  %343 = vst.msk [vmem:[#allocation2 + $0x49] sm:$0x1] %vm318_vm3, %v3611_v12  ;;  %3106 = vmatprep.subr.bf16.mxu1 %v3517_v19  ;;  %v3528_v51 = vld [vmem:[%s4865_s4 + $0x80] sm:$0xff]   ;;  %3164 = vmatprep.subr.bf16.mxu0 %v3527_v48  ;;  %v3531_v62 = vld [vmem:[%s4865_s4 + $0x88] sm:$0xff]  }
  0x34   :  { %344 = vst.msk [vmem:[#allocation2 + $0x59] sm:$0x1] %vm318_vm3, %v3611_v12  ;;  %345 = vst.msk [vmem:[#allocation2 + $0x69] sm:$0x1] %vm318_vm3, %v3611_v12  ;;  %3165 = vmatpush3.bf16.msra.mxu0 %v3528_v51  ;;  %v3532_v17 = vld [vmem:[%s4865_s4 + $0xd0] sm:$0xff]  }
  0x35   :  { %346 = vst.msk [vmem:[#allocation2 + $0x79] sm:$0x1] %vm318_vm3, %v3611_v12  ;;  %347 = vst.msk [vmem:[#allocation2 + $0x89] sm:$0x1] %vm318_vm3, %v3611_v12  ;;  %3166 = vmatprep.subr.bf16.mxu0 %v3530_v59  ;;  %v3533_v18 = vld [vmem:[%s4865_s4 + $0x90] sm:$0xff]  }
  0x36   :  { %350 = vst.msk [vmem:[#allocation2 + $0xb9] sm:$0x1] %vm318_vm3, %v3611_v12  ;;  %351 = vst.msk [vmem:[#allocation2 + $0xc9] sm:$0x1] %vm318_vm3, %v3611_v12  ;;  %3107 = vmatpush3.bf16.msra.mxu1 %v3518_v20 }
  0x37   :  { %352 = vst.msk [vmem:[#allocation2 + $0xd9] sm:$0x1] %vm318_vm3, %v3611_v12  ;;  %353 = vst.msk [vmem:[#allocation2 + $0xe9] sm:$0x1] %vm318_vm3, %v3611_v12  ;;  %3108 = vmatprep.subr.bf16.mxu1 %v3519_v21 }
  0x38   :  { %354 = vst.msk [vmem:[#allocation2 + $0xf9] sm:$0x1] %vm318_vm3, %v3611_v12  ;;  %355 = vst.msk [vmem:[#allocation2 + $0x109] sm:$0x1] %vm318_vm3, %v3611_v12  ;;  %3167 = vmatpush3.bf16.msra.mxu0 %v3531_v62  ;;  %v3537_v62 = vld [vmem:[%s4865_s4 + $0xa0] sm:$0xff]  }
  0x39   :  { %356 = vst.msk [vmem:[#allocation2 + $0x119] sm:$0x1] %vm318_vm3, %v3611_v12  ;;  %357 = vst.msk [vmem:[#allocation2 + $0x129] sm:$0x1] %vm318_vm3, %v3611_v12  ;;  %3168 = vmatprep.subr.bf16.mxu0 %v3532_v17 }
  0x3a   :  { %319 = vst.msk [vmem:[#allocation2] sm:$0x1] %vm318_vm3, %v3611_v12  ;;  %328 = vst.msk [vmem:[#allocation2 + $0x90] sm:$0x1] %vm318_vm3, %v3611_v12  ;;  %3109 = vmatpush3.bf16.msra.mxu1 %v3520_v22 }
  0x3b   :  { %329 = vst.msk [vmem:[#allocation2 + $0xa0] sm:$0x1] %vm318_vm3, %v3611_v12  ;;  %338 = vst.msk [vmem:[#allocation2 + $0x130] sm:$0x1] %vm318_vm3, %v3611_v12  ;;  %3110 = vmatprep.subr.bf16.mxu1 %v3521_v24 }
  0x3c   :  { %310 = vst.msk [vmem:[#allocation2 + $0x8] sm:$0x3] %vm309_vm4, %v3611_v12  ;;  %312 = vst.msk [vmem:[#allocation2 + $0xa8] sm:$0x3] %vm309_vm4, %v3611_v12  ;;  %3169 = vmatpush3.bf16.msra.mxu0 %v3533_v18 }
  0x3d   :  { %315 = vst.msk [vmem:[#allocation2 + $0x98] sm:$0x3] %vm309_vm4, %v3611_v12  ;;  %317 = vst.msk [vmem:[#allocation2 + $0x138] sm:$0x3] %vm309_vm4, %v3611_v12 }
  0x3e   :  { %339 = vst.msk [vmem:[#allocation2 + $0x9] sm:$0x1] %vm318_vm3, %v3611_v12  ;;  %348 = vst.msk [vmem:[#allocation2 + $0x99] sm:$0x1] %vm318_vm3, %v3611_v12  ;;  %3111 = vmatpush3.bf16.msra.mxu1 %v3522_v27  ;;  %v3898_v27 = vld [vmem:[%s4865_s4 + $0x100] sm:$0xff]  }
  0x3f   :  { %349 = vst.msk [vmem:[#allocation2 + $0xa9] sm:$0x1] %vm318_vm3, %v3611_v12  ;;  %358 = vst.msk [vmem:[#allocation2 + $0x139] sm:$0x1] %vm318_vm3, %v3611_v12  ;;  %3112 = vmatprep.subr.bf16.mxu1 %v3523_v35  ;;  %v3535_v35 = vld [vmem:[%s4865_s4 + $0x98] sm:$0xff]  }
  0x42   :  { %3113 = vmatpush3.bf16.msra.mxu1 %v3524_v38 }
  0x43   :  { %3114 = vmatprep.subr.bf16.mxu1 %v3525_v44  ;;  %v400_v22 = vld [vmem:[#allocation2 + $0x1] sm:$0xff] }
  0x46   :  { %3115 = vmatpush3.bf16.msra.mxu1 %v3526_v47 }
  0x47   :  { %3414 = vmatprep.subr.bf16.mxu1 %v3898_v27 }
  0xe1   :  { %v3400_v25 = vpop.f32.mrb[0].mxu0 }
  0xe2   :  { %v254_v28 = vmul.f32 %v3400_v25, %v3799_v23  ;;  %v182_v29 = vpop.f32.mrb[1].mxu0 }
  0xe3   :  { %v252_v30 = vmul.f32 %v3799_v23, %v182_v29  ;;  %v3401_v31 = vpop.f32.mrb[2].mxu0 }
  0xe4   :  { %v277_v32 = vadd.f32 %v3807_v26, %v254_v28  ;;  %v255_v33 = vmul.f32 %v3401_v31, %v3799_v23  ;;  %v185_v34 = vpop.f32.mrb[3].mxu0  ;;  %v3534_v31 = vld [vmem:[%s4865_s4 + $0xd8] sm:$0xff]  }
  0xe5   :  { %v275_v36 = vadd.f32 %v3807_v26, %v252_v30  ;;  %v253_v37 = vmul.f32 %v3799_v23, %v185_v34  ;;  %3170 = vmatprep.subr.bf16.mxu0 %v3534_v31 }
  0xe6   :  { %v293_v39 = vmax.f32 %v277_v32, 0.0  ;;  %v278_v40 = vadd.f32 %v3807_v26, %v255_v33  ;;  %3171 = vmatpush3.bf16.msra.mxu0 %v3535_v35 }
  0xe7   :  { %v291_v41 = vmax.f32 %v275_v36, 0.0  ;;  %v276_v42 = vadd.f32 %v3807_v26, %v253_v37 }
  0xe8   :  { %362 = vst.msk [vmem:[#allocation2 + $0x31] sm:$0xff] %vm307_vm2, %v293_v39  ;;  %v294_v43 = vmax.f32 %v278_v40, 0.0 }
  0xe9   :  { %360 = vst.msk [vmem:[#allocation2 + $0x11] sm:$0xff] %vm307_vm2, %v291_v41  ;;  %v292_v45 = vmax.f32 %v276_v42, 0.0  ;;  %v3404_v46 = vpop.f32.mrb[4].mxu0 }
  0xea   :  { %363 = vst.msk [vmem:[#allocation2 + $0x41] sm:$0xff] %vm307_vm2, %v294_v43  ;;  %v258_v49 = vmul.f32 %v3404_v46, %v3799_v23  ;;  %v198_v50 = vpop.f32.mrb[5].mxu0 }
  0xeb   :  { %361 = vst.msk [vmem:[#allocation2 + $0x21] sm:$0xff] %vm307_vm2, %v292_v45  ;;  %v256_v52 = vmul.f32 %v3799_v23, %v198_v50  ;;  %v3405_v53 = vpop.f32.mrb[6].mxu0 }
  0xec   :  { %v281_v54 = vadd.f32 %v3807_v26, %v258_v49  ;;  %v259_v55 = vmul.f32 %v3405_v53, %v3799_v23  ;;  %v201_v56 = vpop.f32.mrb[7].mxu0 }
  0xed   :  { %v279_v57 = vadd.f32 %v3807_v26, %v256_v52  ;;  %v257_v58 = vmul.f32 %v3799_v23, %v201_v56 }
  0xee   :  { %v297_v60 = vmax.f32 %v281_v54, 0.0  ;;  %v282_v61 = vadd.f32 %v3807_v26, %v259_v55 }
  0xef   :  { %v295_v63 = vmax.f32 %v279_v57, 0.0  ;;  %v280_v0 = vadd.f32 %v3807_v26, %v257_v58  ;;  %v3857_v2 = vld [vmem:[#allocation2 + $0x32] sm:$0xff] }
  0xf0   :  { %366 = vst.msk [vmem:[#allocation2 + $0x71] sm:$0xff] %vm307_vm2, %v297_v60  ;;  %v298_v1 = vmax.f32 %v282_v61, 0.0  ;;  %v3860_v5 = vld [vmem:[#allocation2 + $0x30] sm:$0xff]  ;;  %v3536_v61 = vld [vmem:[%s4865_s4 + $0xe0] sm:$0xff]  }
  0xf1   :  { %364 = vst.msk [vmem:[#allocation2 + $0x51] sm:$0xff] %vm307_vm2, %v295_v63  ;;  %v296_v3 = vmax.f32 %v280_v0, 0.0  ;;  %v3408_v4 = vpop.f32.mrb[8].mxu0  ;;  %v3862_v6 = vld [vmem:[#allocation2 + $0x40] sm:$0xff]  ;;  %v3870_v11 = vld [vmem:[#allocation2 + $0x10] sm:$0xff]  ;;  %3172 = vmatprep.subr.bf16.mxu0 %v3536_v61 }
  0xf2   :  { %v3864_v7 = vld [vmem:[#allocation2 + $0x22] sm:$0xff]  ;;  %367 = vst.msk [vmem:[#allocation2 + $0x81] sm:$0xff] %vm307_vm2, %v298_v1  ;;  %v262_v8 = vmul.f32 %v3408_v4, %v3799_v23  ;;  %v214_v9 = vpop.f32.mrb[9].mxu0  ;;  %v529_v10 = vpack.c.bf16 %v3862_v6, %v3860_v5  ;;  %v3889_v24 = vld [vmem:[#allocation2 + $0x11] sm:$0xff]  ;;  %3173 = vmatpush3.bf16.msra.mxu0 %v3537_v62 }
  0xf3   :  { %v3872_v12 = vld [vmem:[#allocation2 + $0x20] sm:$0xff]  ;;  %365 = vst.msk [vmem:[#allocation2 + $0x61] sm:$0xff] %vm307_vm2, %v296_v3  ;;  %v260_v13 = vmul.f32 %v3799_v23, %v214_v9  ;;  %v3409_v14 = vpop.f32.mrb[10].mxu0  ;;  %v3893_v25 = vpack.c.bf16 %v3857_v2, %v3864_v7  ;;  %v3903_v30 = vld [vmem:[#allocation2 + $0x31] sm:$0xff]  ;;  %v416_v40 = vpack.c.bf16 %v3889_v24, %v400_v22 }
  0xf4   :  { %v528_v15 = vpack.c.bf16 %v3872_v12, %v3870_v11  ;;  %v3878_v16 = vld [vmem:[#allocation2 + $0x21] sm:$0xff]  ;;  %v285_v19 = vadd.f32 %v3807_v26, %v262_v8  ;;  %v263_v20 = vmul.f32 %v3409_v14, %v3799_v23  ;;  %546 = vrot.lane.b32.xlu1 %v529_v10, %s3612_s29  ;;  %v217_v21 = vpop.f32.mrb[11].mxu0  ;;  %v832_v9 = vld [vmem:[#allocation2 + $0x92] sm:$0xff] }
  0xf5   :  { %v283_v28 = vadd.f32 %v3807_v26, %v260_v13  ;;  %v261_v29 = vmul.f32 %v3799_v23, %v217_v21  ;;  %v3911_v34 = vpack.c.bf16 %v3903_v30, %v3878_v16  ;;  %849 = vst.msk [vmem:[#allocation3 + $0x20] sm:$0xff] %vm307_vm2, %v3893_v25  ;;  %v3919_v36 = vld [vmem:[#allocation2 + $0x42] sm:$0xff] }
  0xf6   :  { %544 = vrot.lane.b32.xlu0 %v528_v15, %s3612_s29  ;;  %v301_v32 = vmax.f32 %v285_v19, 0.0  ;;  %v286_v33 = vadd.f32 %v3807_v26, %v263_v20  ;;  %v3925_v41 = vld [vmem:[#allocation2 + $0x41] sm:$0xff] }
  0xf7   :  { %v3921_v37 = vld [vmem:[#allocation2 + $0x72] sm:$0xff]  ;;  %v299_v38 = vmax.f32 %v283_v28, 0.0  ;;  %v284_v39 = vadd.f32 %v3807_v26, %v261_v29  ;;  %v3539_v15 = vld [vmem:[%s4865_s4 + $0xe8] sm:$0xff]  }
  0xf8   :  { %v3927_v42 = vld [vmem:[#allocation2 + $0x52] sm:$0xff]  ;;  %370 = vst.msk [vmem:[#allocation2 + $0xd1] sm:$0xff] %vm307_vm2, %v301_v32  ;;  %v302_v43 = vmax.f32 %v286_v33, 0.0  ;;  %434 = vrot.lane.b32.xlu1 %v3911_v34, %s3612_s29  ;;  %v408_v19 = vld [vmem:[#allocation2 + $0xa1] sm:$0xff]  ;;  %3174 = vmatprep.subr.bf16.mxu0 %v3539_v15 }
  0xf9   :  { %v3932_v44 = vld [vmem:[#allocation2 + $0x51] sm:$0xff]  ;;  %v3938_v46 = vpack.c.bf16 %v3927_v42, %v3919_v36  ;;  %368 = vst.msk [vmem:[#allocation2 + $0xb1] sm:$0xff] %vm307_vm2, %v299_v38  ;;  %v300_v47 = vmax.f32 %v284_v39, 0.0  ;;  %v3412_v48 = vpop.f32.mrb[12].mxu0  ;;  %v3950_v52 = vld [vmem:[#allocation2 + $0x80] sm:$0xff] }
  0xfa   :  { %v3934_v45 = vld [vmem:[#allocation2 + $0x71] sm:$0xff]  ;;  %432 = vrot.lane.b32.xlu0 %v416_v40, %s3612_s29  ;;  %v3944_v49 = vpack.c.bf16 %v3932_v44, %v3925_v41  ;;  %v3952_v53 = vld [vmem:[#allocation2 + $0x62] sm:$0xff]  ;;  %371 = vst.msk [vmem:[#allocation2 + $0xe1] sm:$0xff] %vm307_vm2, %v302_v43  ;;  %v266_v54 = vmul.f32 %v3412_v48, %v3799_v23  ;;  %v230_v55 = vpop.f32.mrb[13].mxu0 }
  0xfb   :  { %v3946_v50 = vld [vmem:[#allocation2 + $0x50] sm:$0xff]  ;;  %v3956_v56 = vld [vmem:[#allocation2 + $0x60] sm:$0xff]  ;;  %850 = vst.msk [vmem:[#allocation3 + $0x48] sm:$0xff] %vm307_vm2, %v3938_v46  ;;  %369 = vst.msk [vmem:[#allocation2 + $0xc1] sm:$0xff] %vm307_vm2, %v300_v47  ;;  %v264_v58 = vmul.f32 %v3799_v23, %v230_v55  ;;  %v3413_v59 = vpop.f32.mrb[14].mxu0  ;;  %v3984_v8 = vpack.c.bf16 %v3921_v37, %v3952_v53 }
  0xfc   :  { %v3948_v51 = vld [vmem:[#allocation2 + $0x70] sm:$0xff]  ;;  %v3958_v57 = vld [vmem:[#allocation2 + $0x61] sm:$0xff]  ;;  %v530_v60 = vpack.c.bf16 %v3956_v56, %v3946_v50  ;;  %v289_v0 = vadd.f32 %v3807_v26, %v266_v54  ;;  %v267_v1 = vmul.f32 %v3413_v59, %v3799_v23  ;;  %436 = vrot.lane.b32.xlu1 %v3944_v49, %s3612_s29  ;;  %v233_v3 = vpop.f32.mrb[15].mxu0 }
  0xfd   :  { %v3972_v63 = vld [vmem:[#allocation2 + $0x82] sm:$0xff]  ;;  %v3980_v4 = vpack.c.bf16 %v3934_v45, %v3958_v57  ;;  %v287_v10 = vadd.f32 %v3807_v26, %v264_v58  ;;  %v265_v13 = vmul.f32 %v3799_v23, %v233_v3  ;;  %v531_v14 = vpack.c.bf16 %v3950_v52, %v3948_v51  ;;  %851 = vst.msk [vmem:[#allocation3 + $0x70] sm:$0xff] %vm307_vm2, %v3984_v8  ;;  %v3541_v54 = vld [vmem:[%s4865_s4 + $0xf0] sm:$0xff]  }
  0xfe   :  { %548 = vrot.lane.b32.xlu0 %v530_v60, %s3612_s29  ;;  %v305_v17 = vmax.f32 %v289_v0, 0.0  ;;  %v290_v18 = vadd.f32 %v3807_v26, %v267_v1  ;;  %v844_v21 = vpack.c.bf16 %v832_v9, %v3972_v63  ;;  %v3540_v48 = vld [vmem:[%s4865_s4 + $0xa8] sm:$0xff]   ;;  %v3542_v60 = vld [vmem:[%s4865_s4 + $0xb0] sm:$0xff]   ;;  %v3543_v0 = vld [vmem:[%s4865_s4 + $0xf8] sm:$0xff]  }
  0xff   :  { %v303_v20 = vmax.f32 %v287_v10, 0.0  ;;  %v288_v23 = vadd.f32 %v3807_v26, %v265_v13  ;;  %v3999_v22 = vld [vmem:[#allocation2 + $0xd2] sm:$0xff]  ;;  %3175 = vmatpush3.bf16.msra.mxu0 %v3540_v48 }
 0x100   :  { %374 = vst.msk [vmem:[#allocation2 + $0x111] sm:$0xff] %vm307_vm2, %v305_v17  ;;  %v306_v28 = vmax.f32 %v290_v18, 0.0  ;;  %438 = vrot.lane.b32.xlu1 %v3980_v4, %s3612_s29  ;;  %v4004_v29 = vld [vmem:[#allocation2 + $0xb1] sm:$0xff]  ;;  %852 = vst.msk [vmem:[#allocation3 + $0x98] sm:$0xff] %vm307_vm2, %v844_v21  ;;  %3176 = vmatprep.subr.bf16.mxu0 %v3541_v54 }
 0x101   :  { %v4006_v31 = vld [vmem:[#allocation2 + $0xb0] sm:$0xff]  ;;  %372 = vst.msk [vmem:[#allocation2 + $0xf1] sm:$0xff] %vm307_vm2, %v303_v20  ;;  %v304_v32 = vmax.f32 %v288_v23, 0.0  ;;  %v420_v26 = vpack.c.bf16 %v4004_v29, %v408_v19  ;;  %v4015_v38 = vld [vmem:[#allocation2 + $0xe0] sm:$0xff] }
 0x102   :  { %550 = vrot.lane.b32.xlu0 %v531_v14, %s3612_s29  ;;  %v4011_v33 = vld [vmem:[#allocation2 + $0xd1] sm:$0xff]  ;;  %v4018_v39 = vld [vmem:[#allocation2 + $0xc2] sm:$0xff]  ;;  %375 = vst.msk [vmem:[#allocation2 + $0x121] sm:$0xff] %vm307_vm2, %v306_v28 }
 0x103   :  { %v4013_v35 = vld [vmem:[#allocation2 + $0xd0] sm:$0xff]  ;;  %v4021_v40 = vld [vmem:[#allocation2 + $0xc0] sm:$0xff]  ;;  %373 = vst.msk [vmem:[#allocation2 + $0x101] sm:$0xff] %vm307_vm2, %v304_v32  ;;  %v4039_v58 = vpack.c.bf16 %v3999_v22, %v4018_v39  ;;  %3177 = vmatpush3.bf16.msra.mxu0 %v3542_v60 }
 0x104   :  { %v4023_v43 = vld [vmem:[#allocation2 + $0xc1] sm:$0xff]  ;;  %v532_v47 = vpack.c.bf16 %v4021_v40, %v4006_v31  ;;  %440 = vrot.lane.b32.xlu1 %v420_v26, %s3612_s29  ;;  %v533_v59 = vpack.c.bf16 %v4015_v38, %v4013_v35  ;;  %v840_v9 = vld [vmem:[#allocation2 + $0x132] sm:$0xff]  ;;  %3178 = vmatprep.subr.bf16.mxu0 %v3543_v0 }
 0x105   :  { %v421_v55 = vpack.c.bf16 %v4011_v33, %v4023_v43  ;;  %v835_v61 = vld [vmem:[#allocation2 + $0xe2] sm:$0xff]  ;;  %853 = vst.msk [vmem:[#allocation3 + $0xc0] sm:$0xff] %vm307_vm2, %v4039_v58  ;;  %v3544_v26 = vld [vmem:[%s4865_s4 + $0xb8] sm:$0xff]  }
 0x106   :  { %552 = vrot.lane.b32.xlu0 %v532_v47, %s3612_s29  ;;  %v4047_v62 = vld [vmem:[#allocation2 + $0xe1] sm:$0xff]  ;;  %v624_v60 = vld [vmem:[#allocation2 + $0x12] sm:$0xff] }
 0x107   :  { %v838_v1 = vld [vmem:[#allocation2 + $0x112] sm:$0xff]  ;;  %3179 = vmatpush3.bf16.msra.mxu0 %v3544_v26  ;;  %v640_v0 = vpack.c.bf16 %v3864_v7, %v624_v60  ;;  %v4106_v26 = vld [vmem:[#allocation2 + $0x81] sm:$0xff] }
 0x108   :  { %v4054_v3 = vld [vmem:[#allocation2 + $0x111] sm:$0xff]  ;;  %442 = vrot.lane.b32.xlu1 %v421_v55, %s3612_s29 }
 0x109   :  { %v836_v10 = vld [vmem:[#allocation2 + $0xf2] sm:$0xff]  ;;  %v839_v15 = vld [vmem:[#allocation2 + $0x122] sm:$0xff] }
 0x10a   :  { %v4057_v13 = vld [vmem:[#allocation2 + $0xf1] sm:$0xff]  ;;  %554 = vrot.lane.b32.xlu0 %v533_v59, %s3612_s29  ;;  %v4066_v19 = vld [vmem:[#allocation2 + $0x120] sm:$0xff]  ;;  %v4068_v20 = vpack.c.bf16 %v836_v10, %v835_v61  ;;  %v848_v54 = vpack.c.bf16 %v840_v9, %v839_v15  ;;  %v641_v9 = vpack.c.bf16 %v3919_v36, %v3857_v2 }
 0x10b   :  { %v4059_v14 = vld [vmem:[#allocation2 + $0xf0] sm:$0xff]  ;;  %v422_v17 = vpack.c.bf16 %v4057_v13, %v4047_v62  ;;  %v837_v23 = vld [vmem:[#allocation2 + $0x102] sm:$0xff] }
 0x10c   :  { %v4064_v18 = vld [vmem:[#allocation2 + $0x110] sm:$0xff]  ;;  %v4070_v21 = vld [vmem:[#allocation2 + $0x100] sm:$0xff]  ;;  %854 = vst.msk [vmem:[#allocation3 + $0xe8] sm:$0xff] %vm307_vm2, %v4068_v20  ;;  %v4084_v48 = vpack.c.bf16 %v838_v1, %v837_v23  ;;  %856 = vst.msk [vmem:[#allocation3 + $0x138] sm:$0xff] %vm307_vm2, %v848_v54 }
 0x10d   :  { %v4072_v28 = vld [vmem:[#allocation2 + $0x101] sm:$0xff]  ;;  %v534_v32 = vpack.c.bf16 %v4070_v21, %v4059_v14  ;;  %444 = vrot.lane.b32.xlu1 %v422_v17, %s3612_s29  ;;  %v535_v59 = vpack.c.bf16 %v4066_v19, %v4064_v18  ;;  %v744_v7 = vld [vmem:[#allocation2 + $0x91] sm:$0xff] }
 0x10e   :  { %v423_v47 = vpack.c.bf16 %v4054_v3, %v4072_v28  ;;  %855 = vst.msk [vmem:[#allocation3 + $0x110] sm:$0xff] %vm307_vm2, %v4084_v48  ;;  %v756_v2 = vpack.c.bf16 %v744_v7, %v4106_v26  ;;  %v4113_v36 = vld [vmem:[#allocation2 + $0xb2] sm:$0xff] }
 0x10f   :  { %556 = vrot.lane.b32.xlu0 %v534_v32, %s3612_s29  ;;  %v642_v32 = vpack.c.bf16 %v3952_v53, %v3927_v42  ;;  %v644_v42 = vpack.c.bf16 %v4018_v39, %v4113_v36  ;;  %v4125_v53 = vld [vmem:[#allocation2 + $0x121] sm:$0xff] }
 0x111   :  { %446 = vrot.lane.b32.xlu1 %v423_v47, %s3612_s29 }
 0x113   :  { %558 = vrot.lane.b32.xlu0 %v535_v59, %s3612_s29 }
 0x115   :  { %656 = vrot.lane.b32.xlu1 %v640_v0, %s3612_s29 }
 0x117   :  { %769 = vrot.lane.b32.xlu0 %v3911_v34, %s3612_s29  ;;  %v643_v34 = vpack.c.bf16 %v3972_v63, %v3921_v37  ;;  %v646_v37 = vpack.c.bf16 %v837_v23, %v836_v10  ;;  %v752_v63 = vld [vmem:[#allocation2 + $0x131] sm:$0xff] }
 0x118   :  { %v760_v39 = vpack.c.bf16 %v752_v63, %v4125_v53 }
 0x119   :  { %658 = vrot.lane.b32.xlu1 %v641_v9, %s3612_s29 }
 0x11b   :  { %771 = vrot.lane.b32.xlu0 %v3944_v49, %s3612_s29  ;;  %v645_v49 = vpack.c.bf16 %v835_v61, %v3999_v22  ;;  %v488_v22 = vld [vmem:[#allocation2 + $0x2] sm:$0xff] }
 0x11c   :  { %v504_v61 = vpack.c.bf16 %v624_v60, %v488_v22  ;;  %v496_v22 = vld [vmem:[#allocation2 + $0xa2] sm:$0xff] }
 0x11d   :  { %660 = vrot.lane.b32.xlu1 %v642_v32, %s3612_s29  ;;  %v393_v32 = vpack.c.bf16 %v3860_v5, %v3872_v12  ;;  %v394_v5 = vpack.c.bf16 %v3946_v50, %v3862_v6 }
 0x11f   :  { %773 = vrot.lane.b32.xlu0 %v3980_v4, %s3612_s29  ;;  %v647_v4 = vpack.c.bf16 %v839_v15, %v838_v1  ;;  %v3538_v1 = vld [vmem:[%s4865_s4 + $0x108] sm:$0xff]  }
 0x121   :  { %662 = vrot.lane.b32.xlu1 %v643_v34, %s3612_s29 }
 0x123   :  { %775 = vrot.lane.b32.xlu0 %v756_v2, %s3612_s29 }
 0x125   :  { %664 = vrot.lane.b32.xlu1 %v644_v42, %s3612_s29 }
 0x127   :  { %777 = vrot.lane.b32.xlu0 %v421_v55, %s3612_s29 }
 0x129   :  { %666 = vrot.lane.b32.xlu1 %v645_v49, %s3612_s29 }
 0x12b   :  { %779 = vrot.lane.b32.xlu0 %v422_v17, %s3612_s29  ;;  %v376_v17 = vld [vmem:[#allocation2] sm:$0xff] }
 0x12c   :  { %v392_v59 = vpack.c.bf16 %v3870_v11, %v376_v17  ;;  %v3545_v11 = vld [vmem:[%s4865_s4 + $0x110] sm:$0xff]  }
 0x12d   :  { %668 = vrot.lane.b32.xlu1 %v646_v37, %s3612_s29 }
 0x12f   :  { %781 = vrot.lane.b32.xlu0 %v423_v47, %s3612_s29 }
 0x131   :  { %670 = vrot.lane.b32.xlu1 %v647_v4, %s3612_s29 }
 0x133   :  { %783 = vrot.lane.b32.xlu0 %v760_v39, %s3612_s29 }
 0x166   :  { %v547_v55 = vpop.permute.xlu1 %546 }
 0x167   :  { %v566_v47 = vsel %vm307_vm2, %v3893_v25, %v547_v55  ;;  %v3546_v25 = vld [vmem:[%s4865_s4 + $0x118] sm:$0xff]   ;;  %v395_v55 = vpack.c.bf16 %v3948_v51, %v3956_v56 }
 0x168   :  { %v545_v54 = vpop.permute.xlu0 %544 }
 0x169   :  { %v562_v10 = vsel %vm307_vm2, %v504_v61, %v545_v54  ;;  %v508_v54 = vpack.c.bf16 %v4113_v36, %v496_v22  ;;  %v728_v22 = vld [vmem:[#allocation2 + $0x130] sm:$0xff] }
 0x16a   :  { %1241 = vmatprep.mubr.bf16.mxu1 %v562_v10  ;;  %v435_v23 = vpop.permute.xlu1 %434 }
 0x16c   :  { %v433_v0 = vpop.permute.xlu0 %432 }
 0x16d   :  { %v450_v15 = vsel %vm307_vm2, %v392_v59, %v433_v0 }
 0x16e   :  { %1242 = vmatmul.mubr.bf16.vlgmr.msra.gmra.mrb[0].mxu1 %v450_v15  ;;  %v437_v60 = vpop.permute.xlu1 %436 }
 0x16f   :  { %3415 = vmatpush3.bf16.msra.mxu1 %v3898_v27  ;;  %1249 = vmatprep.mubr.bf16.mxu1 %v566_v47  ;;  %v454_v27 = vsel %vm307_vm2, %v393_v32, %v435_v23  ;;  %v458_v63 = vsel %vm307_vm2, %v394_v5, %v437_v60  ;;  %v616_v23 = vpack.c.bf16 %v3878_v16, %v3889_v24 }
 0x170   :  { %v549_v9 = vpop.permute.xlu0 %548  ;;  %3416 = vmatprep.subr.bf16.mxu1 %v3538_v1  ;;  %v617_v24 = vpack.c.bf16 %v3925_v41, %v3903_v30  ;;  %v618_v30 = vpack.c.bf16 %v3958_v57, %v3932_v44  ;;  %v619_v44 = vpack.c.bf16 %v4106_v26, %v3934_v45  ;;  %v620_v45 = vpack.c.bf16 %v4023_v43, %v4004_v29 }
 0x171   :  { %v570_v2 = vsel %vm307_vm2, %v3938_v46, %v549_v9 }
 0x172   :  { %v439_v7 = vpop.permute.xlu1 %438 }
 0x173   :  { %3417 = vmatpush3.bf16.msra.mxu1 %v3538_v1  ;;  %v462_v50 = vsel %vm307_vm2, %v395_v55, %v439_v7  ;;  %v720_v7 = vld [vmem:[#allocation2 + $0x90] sm:$0xff] }
 0x174   :  { %v551_v34 = vpop.permute.xlu0 %550  ;;  %3418 = vmatprep.subr.bf16.mxu1 %v3545_v11 }
 0x175   :  { %v574_v4 = vsel %vm307_vm2, %v3984_v8, %v551_v34  ;;  %v384_v8 = vld [vmem:[#allocation2 + $0xa0] sm:$0xff] }
 0x176   :  { %1250 = vmatmul.mubr.bf16.gmra.mrb[4].mxu1 %v454_v27  ;;  %v441_v42 = vpop.permute.xlu1 %440  ;;  %v396_v56 = vpack.c.bf16 %v4006_v31, %v384_v8  ;;  %v397_v31 = vpack.c.bf16 %v4013_v35, %v4021_v40  ;;  %v398_v40 = vpack.c.bf16 %v4059_v14, %v4015_v38  ;;  %v399_v38 = vpack.c.bf16 %v4064_v18, %v4070_v21  ;;  %v866_v18 = vld [vmem:[#allocation3 + $0x48] sm:$0xff]  ;;  %v871_v21 = vld [vmem:[#allocation3 + $0x70] sm:$0xff] }
 0x177   :  { %1257 = vmatprep.mubr.bf16.mxu1 %v570_v2  ;;  %3419 = vmatpush3.bf16.msra.mxu1 %v3545_v11 }
 0x178   :  { %v553_v49 = vpop.permute.xlu0 %552  ;;  %3420 = vmatprep.subr.bf16.mxu1 %v3546_v25  ;;  %v466_v1 = vsel %vm307_vm2, %v396_v56, %v441_v42 }
 0x179   :  { %v578_v17 = vsel %vm307_vm2, %v508_v54, %v553_v49  ;;  %v622_v54 = vpack.c.bf16 %v4072_v28, %v4057_v13 }
 0x17a   :  { %v443_v12 = vpop.permute.xlu1 %442 }
 0x17b   :  { %3421 = vmatpush3.bf16.msra.mxu1 %v3546_v25  ;;  %v732_v25 = vpack.c.bf16 %v720_v7, %v3950_v52 }
 0x17c   :  { %v555_v37 = vpop.permute.xlu0 %554 }
 0x17d   :  { %v582_v47 = vsel %vm307_vm2, %v4039_v58, %v555_v37 }
 0x17e   :  { %1258 = vmatmul.mubr.bf16.gmra.mrb[8].mxu1 %v458_v63 }
 0x17f   :  { %v445_v39 = vpop.permute.xlu1 %444  ;;  %1265 = vmatprep.mubr.bf16.mxu1 %v574_v4  ;;  %v621_v4 = vpack.c.bf16 %v4047_v62, %v4011_v33  ;;  %v736_v33 = vpack.c.bf16 %v728_v22, %v4066_v19  ;;  %v896_v19 = vld [vmem:[#allocation3 + $0x138] sm:$0xff] }
 0x181   :  { %v557_v46 = vpop.permute.xlu0 %556 }
 0x182   :  { %v586_v58 = vsel %vm307_vm2, %v4068_v20, %v557_v46  ;;  %v474_v20 = vsel %vm307_vm2, %v398_v40, %v445_v39  ;;  %v876_v46 = vld [vmem:[#allocation3 + $0x98] sm:$0xff] }
 0x183   :  { %v447_v61 = vpop.permute.xlu1 %446 }
 0x184   :  { %v478_v49 = vsel %vm307_vm2, %v399_v38, %v447_v61 }
 0x185   :  { %v559_v6 = vpop.permute.xlu0 %558 }
 0x186   :  { %1266 = vmatmul.mubr.bf16.gmra.mrb[12].mxu1 %v462_v50  ;;  %v590_v2 = vsel %vm307_vm2, %v4084_v48, %v559_v6  ;;  %v861_v48 = vld [vmem:[#allocation3 + $0x20] sm:$0xff] }
 0x187   :  { %v657_v10 = vpop.permute.xlu1 %656  ;;  %1273 = vmatprep.mubr.bf16.mxu1 %v578_v17  ;;  %v886_v17 = vld [vmem:[#allocation3 + $0xe8] sm:$0xff] }
 0x188   :  { %v674_v51 = vsel %vm307_vm2, %v616_v23, %v657_v10  ;;  %v891_v10 = vld [vmem:[#allocation3 + $0x110] sm:$0xff]  ;;  %v623_v23 = vpack.c.bf16 %v4125_v53, %v4054_v3  ;;  %v3547_v53 = vld [vmem:[%s4868_s7 + $0x40] sm:$0xff]  }
 0x189   :  { %v770_v59 = vpop.permute.xlu0 %769  ;;  %3240 = vmatprep.subr.bf16.mxu0 %v3547_v53 }
 0x18a   :  { %v787_v0 = vsel %vm307_vm2, %v393_v32, %v770_v59  ;;  %v470_v32 = vsel %vm307_vm2, %v397_v31, %v443_v12 }
 0x18b   :  { %1338 = vmatprep.mubr.bf16.mxu0 %v787_v0  ;;  %v659_v16 = vpop.permute.xlu1 %658 }
 0x18c   :  { %1339 = vmatmul.mubr.bf16.vlgmr.msra.gmra.mrb[16].mxu0 %v674_v51  ;;  %v678_v9 = vsel %vm307_vm2, %v617_v24, %v659_v16 }
 0x18d   :  { %v772_v36 = vpop.permute.xlu0 %771 }
 0x18e   :  { %v791_v15 = vsel %vm307_vm2, %v394_v5, %v772_v36  ;;  %1274 = vmatmul.mubr.bf16.gmra.mrb[16].mxu1 %v466_v1 }
 0x18f   :  { %1346 = vmatprep.mubr.bf16.mxu0 %v791_v15  ;;  %1281 = vmatprep.mubr.bf16.mxu1 %v582_v47  ;;  %v661_v34 = vpop.permute.xlu1 %660 }
 0x190   :  { %v682_v35 = vsel %vm307_vm2, %v618_v30, %v661_v34  ;;  %v3550_v30 = vld [vmem:[%s4868_s7 + $0x8] sm:$0xff]  }
 0x191   :  { %v774_v60 = vpop.permute.xlu0 %773 }
 0x192   :  { %v795_v11 = vsel %vm307_vm2, %v395_v55, %v774_v60  ;;  %v881_v55 = vld [vmem:[#allocation3 + $0xc0] sm:$0xff] }
 0x193   :  { %v663_v42 = vpop.permute.xlu1 %662 }
 0x194   :  { %1347 = vmatmul.mubr.bf16.gmra.mrb[20].mxu0 %v678_v9  ;;  %v686_v57 = vsel %vm307_vm2, %v619_v44, %v663_v42 }
 0x195   :  { %1354 = vmatprep.mubr.bf16.mxu0 %v795_v11  ;;  %v776_v41 = vpop.permute.xlu0 %775 }
 0x196   :  { %1282 = vmatmul.mubr.bf16.gmra.mrb[20].mxu1 %v470_v32  ;;  %v799_v27 = vsel %vm307_vm2, %v732_v25, %v776_v41  ;;  %v3548_v32 = vld [vmem:[%s4868_s7] sm:$0xff]   ;;  %v3551_v41 = vld [vmem:[%s4868_s7 + $0x50] sm:$0xff]  }
 0x197   :  { %1289 = vmatprep.mubr.bf16.mxu1 %v586_v58  ;;  %v665_v5 = vpop.permute.xlu1 %664  ;;  %v3549_v58 = vld [vmem:[%s4868_s7 + $0x48] sm:$0xff]   ;;  %3241 = vmatpush3.bf16.msra.mxu0 %v3548_v32  ;;  %v3561_v25 = vld [vmem:[%s4868_s7 + $0xc0] sm:$0xff]  }
 0x198   :  { %v690_v12 = vsel %vm307_vm2, %v620_v45, %v665_v5  ;;  %3242 = vmatprep.subr.bf16.mxu0 %v3549_v58  ;;  %3304 = vmatprep.subr.bf16.mxu1 %v3561_v25 }
 0x199   :  { %v778_v52 = vpop.permute.xlu0 %777 }
 0x19a   :  { %v803_v14 = vsel %vm307_vm2, %v397_v31, %v778_v52 }
 0x19b   :  { %v667_v63 = vpop.permute.xlu1 %666  ;;  %3243 = vmatpush3.bf16.msra.mxu0 %v3550_v30 }
 0x19c   :  { %1355 = vmatmul.mubr.bf16.gmra.mrb[24].mxu0 %v682_v35  ;;  %v694_v29 = vsel %vm307_vm2, %v621_v4, %v667_v63  ;;  %v3562_v35 = vld [vmem:[%s4868_s7 + $0x80] sm:$0xff]   ;;  %3244 = vmatprep.subr.bf16.mxu0 %v3551_v41  ;;  %v3557_v4 = vld [vmem:[%s4868_s7 + $0x68] sm:$0xff]  }
 0x19d   :  { %1362 = vmatprep.mubr.bf16.mxu0 %v799_v27  ;;  %v780_v26 = vpop.permute.xlu0 %779  ;;  %v3552_v27 = vld [vmem:[%s4868_s7 + $0x10] sm:$0xff]  }
 0x19e   :  { %1290 = vmatmul.mubr.bf16.gmra.mrb[24].mxu1 %v474_v20  ;;  %v807_v37 = vsel %vm307_vm2, %v398_v40, %v780_v26 }
 0x19f   :  { %1297 = vmatprep.mubr.bf16.mxu1 %v590_v2  ;;  %v669_v61 = vpop.permute.xlu1 %668  ;;  %v3553_v2 = vld [vmem:[%s4868_s7 + $0x58] sm:$0xff]   ;;  %3245 = vmatpush3.bf16.msra.mxu0 %v3552_v27 }
 0x1a0   :  { %v698_v62 = vsel %vm307_vm2, %v622_v54, %v669_v61  ;;  %3246 = vmatprep.subr.bf16.mxu0 %v3553_v2  ;;  %v3559_v54 = vld [vmem:[%s4868_s7 + $0x70] sm:$0xff]  }
 0x1a1   :  { %v782_v39 = vpop.permute.xlu0 %781 }
 0x1a2   :  { %v811_v43 = vsel %vm307_vm2, %v399_v38, %v782_v39  ;;  %v3554_v38 = vld [vmem:[%s4868_s7 + $0x18] sm:$0xff]  }
 0x1a3   :  { %v671_v8 = vpop.permute.xlu1 %670  ;;  %3247 = vmatpush3.bf16.msra.mxu0 %v3554_v38 }
 0x1a4   :  { %1363 = vmatmul.mubr.bf16.gmra.mrb[28].mxu0 %v686_v57  ;;  %v702_v13 = vsel %vm307_vm2, %v623_v23, %v671_v8 }
 0x1a5   :  { %1370 = vmatprep.mubr.bf16.mxu0 %v803_v14  ;;  %v784_v6 = vpop.permute.xlu0 %783 }
 0x1a6   :  { %1298 = vmatmul.mubr.bf16.gmra.mrb[28].mxu1 %v478_v49  ;;  %v815_v50 = vsel %vm307_vm2, %v736_v33, %v784_v6  ;;  %v3555_v49 = vld [vmem:[%s4868_s7 + $0x60] sm:$0xff]  }
 0x1a7   :  { %3422 = vmatprep.mubr.msk.bf16.mxu1 %vm307_vm2, %v861_v48  ;;  %3248 = vmatprep.subr.bf16.mxu0 %v3555_v49 }
 0x1ac   :  { %1371 = vmatmul.mubr.bf16.gmra.mrb[32].mxu0 %v690_v12 }
 0x1ad   :  { %1378 = vmatprep.mubr.bf16.mxu0 %v807_v37  ;;  %v3556_v37 = vld [vmem:[%s4868_s7 + $0x20] sm:$0xff]  }
 0x1ae   :  { %3423 = vmatmul.mubr.msk.bf16.vlgmr.msra.gmra.mrb[32].mxu1 %vm307_vm2, %v866_v18  ;;  %3249 = vmatpush3.bf16.msra.mxu0 %v3556_v37 }
 0x1af   :  { %3426 = vmatprep.mubr.msk.bf16.mxu1 %vm307_vm2, %v871_v21  ;;  %3305 = vmatpush3.bf16.msra.mxu1 %v3562_v35 }
 0x1b0   :  { %3250 = vmatprep.subr.bf16.mxu0 %v3557_v4 }
 0x1b4   :  { %1379 = vmatmul.mubr.bf16.gmra.mrb[36].mxu0 %v694_v29 }
 0x1b5   :  { %1386 = vmatprep.mubr.bf16.mxu0 %v811_v43 }
 0x1b6   :  { %3427 = vmatmul.mubr.msk.bf16.gmra.mrb[36].mxu1 %vm307_vm2, %v876_v46 }
 0x1b7   :  { %3430 = vmatprep.mubr.msk.bf16.mxu1 %vm307_vm2, %v881_v55  ;;  %v3558_v55 = vld [vmem:[%s4868_s7 + $0x28] sm:$0xff]  }
 0x1b8   :  { %3251 = vmatpush3.bf16.msra.mxu0 %v3558_v55 }
 0x1b9   :  { %3252 = vmatprep.subr.bf16.mxu0 %v3559_v54 }
 0x1bc   :  { %1387 = vmatmul.mubr.bf16.gmra.mrb[40].mxu0 %v698_v62 }
 0x1bd   :  { %1394 = vmatprep.mubr.bf16.mxu0 %v815_v50 }
 0x1be   :  { %3431 = vmatmul.mubr.msk.bf16.gmra.mrb[40].mxu1 %vm307_vm2, %v886_v17 }
 0x1bf   :  { %3434 = vmatprep.mubr.msk.bf16.mxu1 %vm307_vm2, %v891_v10  ;;  %v3560_v10 = vld [vmem:[%s4868_s7 + $0x30] sm:$0xff]  }
 0x1c0   :  { %3253 = vmatpush3.bf16.msra.mxu0 %v3560_v10 }
 0x1c4   :  { %1395 = vmatmul.mubr.bf16.gmra.mrb[44].mxu0 %v702_v13 }
 0x1c6   :  { %3435 = vmatmul.mubr.msk.bf16.gmra.mrb[44].mxu1 %vm307_vm2, %v896_v19 }
 0x241   :  { %v3116_v28 = vpop.f32.mrb[0].mxu1 }
 0x242   :  { %v3117_v59 = vpop.f32.mrb[1].mxu1 }
 0x243   :  { %v3118_v0 = vadd.f32 %v3117_v59, %v3116_v28  ;;  %v3119_v51 = vpop.f32.mrb[2].mxu1 }
 0x244   :  { %v3120_v56 = vpop.f32.mrb[3].mxu1 }
 0x245   :  { %v3121_v36 = vadd.f32 %v3120_v56, %v3119_v51 }
 0x249   :  { %v3122_v1 = vpop.f32.mrb[4].mxu1 }
 0x24a   :  { %v3123_v15 = vpop.f32.mrb[5].mxu1 }
 0x24b   :  { %v4220_v47 = vadd.f32 %v3123_v15, %v3122_v1  ;;  %v3125_v16 = vpop.f32.mrb[6].mxu1 }
 0x24c   :  { %v3126_v24 = vpop.f32.mrb[7].mxu1 }
 0x24d   :  { %v4222_v60 = vadd.f32 %v3126_v24, %v3125_v16 }
 0x251   :  { %v3128_v3 = vpop.f32.mrb[8].mxu1 }
 0x252   :  { %v3129_v9 = vpop.f32.mrb[9].mxu1 }
 0x253   :  { %v4227_v31 = vadd.f32 %v3129_v9, %v3128_v3  ;;  %v3131_v11 = vpop.f32.mrb[10].mxu1 }
 0x254   :  { %v3132_v7 = vpop.f32.mrb[11].mxu1 }
 0x255   :  { %v4235_v34 = vadd.f32 %v3132_v7, %v3131_v11 }
 0x259   :  { %v3134_v40 = vpop.f32.mrb[12].mxu1 }
 0x25a   :  { %v3135_v20 = vpop.f32.mrb[13].mxu1 }
 0x25b   :  { %v4255_v42 = vadd.f32 %v3135_v20, %v3134_v40  ;;  %v3137_v44 = vpop.f32.mrb[14].mxu1 }
 0x25c   :  { %v3138_v52 = vpop.f32.mrb[15].mxu1 }
 0x25d   :  { %v4257_v57 = vadd.f32 %v3138_v52, %v3137_v44 }
 0x25f   :  { %v3180_v14 = vpop.f32.mrb[16].mxu0 }
 0x260   :  { %v3181_v48 = vpop.f32.mrb[17].mxu0 }
 0x261   :  { %v3182_v5 = vadd.f32 %v3181_v48, %v3180_v14  ;;  %v3183_v45 = vpop.f32.mrb[18].mxu0  ;;  %v3140_v26 = vpop.f32.mrb[16].mxu1 }
 0x262   :  { %v3184_v12 = vpop.f32.mrb[19].mxu0  ;;  %v3141_v21 = vpop.f32.mrb[17].mxu1 }
 0x263   :  { %v3185_v18 = vadd.f32 %v3184_v12, %v3183_v45  ;;  %v4268_v63 = vadd.f32 %v3182_v5, %v3118_v0  ;;  %v4273_v39 = vadd.f32 %v3141_v21, %v3140_v26  ;;  %v3143_v29 = vpop.f32.mrb[18].mxu1  ;;  %v3563_v45 = vld [vmem:[%s4868_s7 + $0xc8] sm:$0xff]  }
 0x264   :  { %v3144_v43 = vpop.f32.mrb[19].mxu1  ;;  %3306 = vmatprep.subr.bf16.mxu1 %v3563_v45 }
 0x265   :  { %v4275_v46 = vadd.f32 %v3185_v18, %v3121_v36  ;;  %v4277_v22 = vadd.f32 %v3144_v43, %v3143_v29  ;;  %v4327_v29 = vld [vmem:[%s4867_s6] ss:$0 sm:$0xff] }
 0x267   :  { %v3186_v61 = vpop.f32.mrb[20].mxu0 }
 0x268   :  { %v3187_v6 = vpop.f32.mrb[21].mxu0 }
 0x269   :  { %v3188_v33 = vadd.f32 %v3187_v6, %v3186_v61  ;;  %v3189_v62 = vpop.f32.mrb[22].mxu0  ;;  %v3146_v50 = vpop.f32.mrb[20].mxu1 }
 0x26a   :  { %v3190_v17 = vpop.f32.mrb[23].mxu0  ;;  %v3147_v23 = vpop.f32.mrb[21].mxu1 }
 0x26b   :  { %v3191_v8 = vadd.f32 %v3190_v17, %v3189_v62  ;;  %v1349_v13 = vadd.f32 %v3188_v33, %v4220_v47  ;;  %v4289_v19 = vadd.f32 %v3147_v23, %v3146_v50  ;;  %v3149_v28 = vpop.f32.mrb[22].mxu1 }
 0x26c   :  { %v3150_v59 = vpop.f32.mrb[23].mxu1 }
 0x26d   :  { %v1352_v0 = vadd.f32 %v3191_v8, %v4222_v60  ;;  %v4292_v51 = vadd.f32 %v3150_v59, %v3149_v28 }
 0x26f   :  { %v3192_v56 = vpop.f32.mrb[24].mxu0 }
 0x270   :  { %v3193_v36 = vpop.f32.mrb[25].mxu0 }
 0x271   :  { %v3194_v1 = vadd.f32 %v3193_v36, %v3192_v56  ;;  %v3195_v15 = vpop.f32.mrb[26].mxu0  ;;  %v3152_v16 = vpop.f32.mrb[24].mxu1 }
 0x272   :  { %v3196_v24 = vpop.f32.mrb[27].mxu0  ;;  %v3153_v53 = vpop.f32.mrb[25].mxu1 }
 0x273   :  { %v3197_v3 = vadd.f32 %v3196_v24, %v3195_v15  ;;  %v4295_v47 = vadd.f32 %v3194_v1, %v4227_v31  ;;  %v4297_v9 = vadd.f32 %v3153_v53, %v3152_v16  ;;  %v3155_v11 = vpop.f32.mrb[26].mxu1 }
 0x274   :  { %v3156_v32 = vpop.f32.mrb[27].mxu1 }
 0x275   :  { %v4300_v60 = vadd.f32 %v3197_v3, %v4235_v34  ;;  %v4302_v58 = vadd.f32 %v3156_v32, %v3155_v11  ;;  %v3565_v32 = vld [vmem:[%s4868_s7 + $0x78] sm:$0xff]  }
 0x276   :  { %3254 = vmatprep.subr.bf16.mxu0 %v3565_v32 }
 0x277   :  { %v3198_v7 = vpop.f32.mrb[28].mxu0 }
 0x278   :  { %v3199_v30 = vpop.f32.mrb[29].mxu0 }
 0x279   :  { %v3200_v41 = vadd.f32 %v3199_v30, %v3198_v7  ;;  %v3201_v25 = vpop.f32.mrb[30].mxu0  ;;  %v3158_v35 = vpop.f32.mrb[28].mxu1  ;;  %v3569_v7 = vld [vmem:[%s4868_s7 + $0xd8] sm:$0xff]  }
 0x27a   :  { %v3202_v40 = vpop.f32.mrb[31].mxu0  ;;  %v3159_v20 = vpop.f32.mrb[29].mxu1 }
 0x27b   :  { %v3203_v27 = vadd.f32 %v3202_v40, %v3201_v25  ;;  %v1365_v31 = vadd.f32 %v3200_v41, %v4255_v42  ;;  %v4305_v2 = vadd.f32 %v3159_v20, %v3158_v35  ;;  %v3161_v44 = vpop.f32.mrb[30].mxu1  ;;  %v4316_v42 = vld [vmem:[%s4866_s5] ss:$0 sm:$0xff]  ;;  %v3566_v35 = vld [vmem:[%s4868_s7 + $0x38] sm:$0xff]  }
 0x27c   :  { %v3162_v52 = vpop.f32.mrb[31].mxu1  ;;  %3255 = vmatpush3.bf16.msra.mxu0 %v3566_v35 }
 0x27d   :  { %v1368_v38 = vadd.f32 %v3203_v27, %v4257_v57  ;;  %v4308_v34 = vadd.f32 %v3162_v52, %v3161_v44  ;;  %v3564_v57 = vld [vmem:[%s4868_s7 + $0x88] sm:$0xff]  }
 0x27e   :  { %3307 = vmatpush3.bf16.msra.mxu1 %v3564_v57 }
 0x27f   :  { %v3204_v14 = vpop.f32.mrb[32].mxu0 }
 0x280   :  { %v3205_v49 = vpop.f32.mrb[33].mxu0 }
 0x281   :  { %v3206_v48 = vadd.f32 %v3205_v49, %v3204_v14  ;;  %v3207_v5 = vpop.f32.mrb[34].mxu0  ;;  %v3424_v12 = vpop.f32.mrb[32].mxu1 }
 0x282   :  { %v3208_v26 = vpop.f32.mrb[35].mxu0  ;;  %v1446_v18 = vadd.f32 %v3424_v12, %v1349_v13  ;;  %v1437_v21 = vpop.f32.mrb[33].mxu1 }
 0x283   :  { %v3209_v37 = vadd.f32 %v3208_v26, %v3207_v5  ;;  %v4322_v4 = vadd.f32 %v3206_v48, %v4273_v39  ;;  %v1438_v43 = vadd.f32 %v1437_v21, %v4268_v63  ;;  %v3425_v55 = vpop.f32.mrb[34].mxu1  ;;  %v3567_v63 = vld [vmem:[%s4868_s7 + $0xd0] sm:$0xff]  }
 0x284   :  { %v1509_v61 = vmul.f32 %v4316_v42, %v1446_v18  ;;  %v1449_v54 = vadd.f32 %v3425_v55, %v1352_v0  ;;  %v1440_v6 = vpop.f32.mrb[35].mxu1  ;;  %3308 = vmatprep.subr.bf16.mxu1 %v3567_v63 }
 0x285   :  { %v4332_v33 = vadd.f32 %v3209_v37, %v4277_v22  ;;  %v1507_v39 = vmul.f32 %v4316_v42, %v1438_v43  ;;  %v1441_v62 = vadd.f32 %v1440_v6, %v4275_v46  ;;  %v3568_v22 = vld [vmem:[%s4868_s7 + $0x90] sm:$0xff]   ;;  %v1602_v37 = vld [vmem:[#allocation2 + $0x1] sm:$0xff] }
 0x286   :  { %v1532_v50 = vadd.f32 %v4327_v29, %v1509_v61  ;;  %v1510_v17 = vmul.f32 %v4316_v42, %v1449_v54  ;;  %3309 = vmatpush3.bf16.msra.mxu1 %v3568_v22 }
 0x287   :  { %v3210_v10 = vpop.f32.mrb[36].mxu0  ;;  %v1530_v8 = vadd.f32 %v4327_v29, %v1507_v39  ;;  %v1508_v23 = vmul.f32 %v4316_v42, %v1441_v62  ;;  %3310 = vmatprep.subr.bf16.mxu1 %v3569_v7 }
 0x288   :  { %v3211_v13 = vpop.f32.mrb[37].mxu0  ;;  %v1548_v28 = vmax.f32 %v1532_v50, 0.0  ;;  %v1533_v46 = vadd.f32 %v4327_v29, %v1510_v17 }
 0x289   :  { %v3212_v59 = vadd.f32 %v3211_v13, %v3210_v10  ;;  %v3213_v0 = vpop.f32.mrb[38].mxu0  ;;  %v1546_v56 = vmax.f32 %v1530_v8, 0.0  ;;  %v1531_v36 = vadd.f32 %v4327_v29, %v1508_v23  ;;  %v3428_v15 = vpop.f32.mrb[36].mxu1 }
 0x28a   :  { %v3214_v1 = vpop.f32.mrb[39].mxu0  ;;  %1564 = vst.msk [vmem:[#allocation2 + $0x31] sm:$0xff] %vm307_vm2, %v1548_v28  ;;  %v1549_v16 = vmax.f32 %v1533_v46, 0.0  ;;  %v1462_v3 = vadd.f32 %v3428_v15, %v1365_v31  ;;  %v1453_v53 = vpop.f32.mrb[37].mxu1 }
 0x28b   :  { %v3215_v24 = vadd.f32 %v3214_v1, %v3213_v0  ;;  %v1381_v11 = vadd.f32 %v3212_v59, %v4289_v19  ;;  %1562 = vst.msk [vmem:[#allocation2 + $0x11] sm:$0xff] %vm307_vm2, %v1546_v56  ;;  %v1547_v30 = vmax.f32 %v1531_v36, 0.0  ;;  %v1454_v41 = vadd.f32 %v1453_v53, %v4295_v47  ;;  %v3429_v25 = vpop.f32.mrb[38].mxu1  ;;  %v3570_v19 = vld [vmem:[%s4868_s7 + $0x98] sm:$0xff]  }
 0x28c   :  { %1565 = vst.msk [vmem:[#allocation2 + $0x41] sm:$0xff] %vm307_vm2, %v1549_v16  ;;  %v1513_v40 = vmul.f32 %v4316_v42, %v1462_v3  ;;  %v1465_v27 = vadd.f32 %v3429_v25, %v1368_v38  ;;  %v1456_v20 = vpop.f32.mrb[39].mxu1  ;;  %3311 = vmatpush3.bf16.msra.mxu1 %v3570_v19  ;;  %v3572_v38 = vld [vmem:[%s4868_s7 + $0xe0] sm:$0xff]  }
 0x28d   :  { %v1384_v31 = vadd.f32 %v3215_v24, %v4292_v51  ;;  %1563 = vst.msk [vmem:[#allocation2 + $0x21] sm:$0xff] %vm307_vm2, %v1547_v30  ;;  %v1511_v47 = vmul.f32 %v4316_v42, %v1454_v41  ;;  %v1457_v44 = vadd.f32 %v1456_v20, %v4300_v60  ;;  %v3573_v60 = vld [vmem:[%s4868_s7 + $0xa0] sm:$0xff]   ;;  %3312 = vmatprep.subr.bf16.mxu1 %v3572_v38  ;;  %v3575_v24 = vld [vmem:[%s4868_s7 + $0xa8] sm:$0xff]   ;;  %v3576_v30 = vld [vmem:[%s4868_s7 + $0xf0] sm:$0xff]  }
 0x28e   :  { %v1536_v52 = vadd.f32 %v4327_v29, %v1513_v40  ;;  %v1514_v14 = vmul.f32 %v4316_v42, %v1465_v27  ;;  %v4412_v16 = vld [vmem:[%s4868_s7 + $0x100] sm:$0xff]  }
 0x28f   :  { %v3216_v49 = vpop.f32.mrb[40].mxu0  ;;  %v1534_v51 = vadd.f32 %v4327_v29, %v1511_v47  ;;  %v1512_v48 = vmul.f32 %v4316_v42, %v1457_v44  ;;  %3438 = vmatprep.subr.bf16.mxu0 %v4412_v16 }
 0x290   :  { %v3217_v5 = vpop.f32.mrb[41].mxu0  ;;  %v1552_v45 = vmax.f32 %v1536_v52, 0.0  ;;  %v1537_v26 = vadd.f32 %v4327_v29, %v1514_v14  ;;  %3313 = vmatpush3.bf16.msra.mxu1 %v3573_v60 }
 0x291   :  { %v3218_v12 = vadd.f32 %v3217_v5, %v3216_v49  ;;  %v3219_v57 = vpop.f32.mrb[42].mxu0  ;;  %v1550_v18 = vmax.f32 %v1534_v51, 0.0  ;;  %v1535_v21 = vadd.f32 %v4327_v29, %v1512_v48  ;;  %v3432_v55 = vpop.f32.mrb[40].mxu1  ;;  %v1716_v13 = vld [vmem:[#allocation2 + $0x30] sm:$0xff] }
 0x292   :  { %v3220_v43 = vpop.f32.mrb[43].mxu0  ;;  %1568 = vst.msk [vmem:[#allocation2 + $0x71] sm:$0xff] %vm307_vm2, %v1552_v45  ;;  %v1553_v61 = vmax.f32 %v1537_v26, 0.0  ;;  %v1478_v6 = vadd.f32 %v3432_v55, %v1381_v11  ;;  %v1469_v39 = vpop.f32.mrb[41].mxu1  ;;  %v4383_v62 = vld [vmem:[#allocation2 + $0x11] sm:$0xff] }
 0x293   :  { %v3221_v54 = vadd.f32 %v3220_v43, %v3219_v57  ;;  %v4386_v50 = vadd.f32 %v3218_v12, %v4297_v9  ;;  %1566 = vst.msk [vmem:[#allocation2 + $0x51] sm:$0xff] %vm307_vm2, %v1550_v18  ;;  %v1551_v17 = vmax.f32 %v1535_v21, 0.0  ;;  %v1470_v10 = vadd.f32 %v1469_v39, %v4322_v4  ;;  %v3433_v63 = vpop.f32.mrb[42].mxu1  ;;  %v4391_v23 = vld [vmem:[#allocation2 + $0x10] sm:$0xff]  ;;  %v4393_v22 = vld [vmem:[#allocation2 + $0x40] sm:$0xff] }
 0x294   :  { %v1618_v8 = vpack.c.bf16 %v4383_v62, %v1602_v37  ;;  %1569 = vst.msk [vmem:[#allocation2 + $0x81] sm:$0xff] %vm307_vm2, %v1553_v61  ;;  %v1517_v28 = vmul.f32 %v4316_v42, %v1478_v6  ;;  %v1481_v46 = vadd.f32 %v3433_v63, %v1384_v31  ;;  %v1472_v9 = vpop.f32.mrb[43].mxu1  ;;  %v1715_v59 = vld [vmem:[#allocation2 + $0x20] sm:$0xff]  ;;  %v4422_v11 = vld [vmem:[#allocation2 + $0x31] sm:$0xff]  ;;  %v1731_v32 = vpack.c.bf16 %v4393_v22, %v1716_v13 }
 0x295   :  { %v4397_v0 = vld [vmem:[#allocation2 + $0x21] sm:$0xff]  ;;  %v4400_v56 = vadd.f32 %v3221_v54, %v4302_v58  ;;  %1567 = vst.msk [vmem:[#allocation2 + $0x61] sm:$0xff] %vm307_vm2, %v1551_v17  ;;  %v1515_v36 = vmul.f32 %v4316_v42, %v1470_v10  ;;  %v1473_v1 = vadd.f32 %v1472_v9, %v4332_v33  ;;  %v1730_v15 = vpack.c.bf16 %v1715_v59, %v4391_v23  ;;  %v4437_v40 = vld [vmem:[#allocation2 + $0x32] sm:$0xff] }
 0x296   :  { %v4402_v4 = vld [vmem:[#allocation2 + $0x22] sm:$0xff]  ;;  %1634 = vrot.lane.b32.xlu1 %v1618_v8, %s3612_s29  ;;  %v1540_v3 = vadd.f32 %v4327_v29, %v1517_v28  ;;  %v1518_v33 = vmul.f32 %v4316_v42, %v1481_v46  ;;  %v4435_v19 = vpack.c.bf16 %v4422_v11, %v4397_v0  ;;  %v4439_v27 = vpack.c.bf16 %v1716_v13, %v1715_v59  ;;  %v3577_v18 = vld [vmem:[%s4868_s7 + $0xb0] sm:$0xff]   ;;  %v3578_v9 = vld [vmem:[%s4868_s7 + $0xf8] sm:$0xff]  }
 0x297   :  { %v3574_v58 = vld [vmem:[%s4868_s7 + $0xe8] sm:$0xff]   ;;  %v3222_v53 = vpop.f32.mrb[44].mxu0  ;;  %v1538_v41 = vadd.f32 %v4327_v29, %v1515_v36  ;;  %v1516_v25 = vmul.f32 %v4316_v42, %v1473_v1  ;;  %1746 = vrot.lane.b32.xlu0 %v1730_v15, %s3612_s29  ;;  %v4444_v52 = vpack.c.bf16 %v4437_v40, %v4402_v4  ;;  %v1818_v48 = vpack.c.bf16 %v4397_v0, %v4383_v62 }
 0x298   :  { %v4425_v7 = vld [vmem:[#allocation2 + $0x41] sm:$0xff]  ;;  %v3223_v35 = vpop.f32.mrb[45].mxu0  ;;  %v1556_v20 = vmax.f32 %v1540_v3, 0.0  ;;  %v1541_v31 = vadd.f32 %v4327_v29, %v1518_v33  ;;  %3314 = vmatprep.subr.bf16.mxu1 %v3574_v58  ;;  %v3579_v58 = vld [vmem:[%s4868_s7 + $0xb8] sm:$0xff]  }
 0x299   :  { %v3224_v47 = vadd.f32 %v3223_v35, %v3222_v53  ;;  %v3225_v44 = vpop.f32.mrb[46].mxu0  ;;  %v1554_v14 = vmax.f32 %v1538_v41, 0.0  ;;  %v1539_v49 = vadd.f32 %v4327_v29, %v1516_v25  ;;  %v3436_v51 = vpop.f32.mrb[44].mxu1  ;;  %3315 = vmatpush3.bf16.msra.mxu1 %v3575_v24  ;;  %v1819_v5 = vpack.c.bf16 %v4425_v7, %v4422_v11  ;;  %2050 = vst.msk [vmem:[#allocation3 + $0x20] sm:$0xff] %vm307_vm2, %v4444_v52  ;;  %v4470_v61 = vld [vmem:[#allocation2 + $0x71] sm:$0xff]  ;;  %v4479_v63 = vld [vmem:[#allocation2 + $0x42] sm:$0xff] }
 0x29a   :  { %v3226_v38 = vpop.f32.mrb[47].mxu0  ;;  %1636 = vrot.lane.b32.xlu1 %v4435_v19, %s3612_s29  ;;  %1572 = vst.msk [vmem:[#allocation2 + $0xd1] sm:$0xff] %vm307_vm2, %v1556_v20  ;;  %v1557_v60 = vmax.f32 %v1541_v31, 0.0  ;;  %v1485_v12 = vpop.f32.mrb[45].mxu1  ;;  %v4456_v57 = vld [vmem:[#allocation2 + $0x51] sm:$0xff]  ;;  %3316 = vmatprep.subr.bf16.mxu1 %v3576_v30 }
 0x29b   :  { %v3227_v45 = vadd.f32 %v3226_v38, %v3225_v44  ;;  %v1397_v26 = vadd.f32 %v3224_v47, %v4305_v2  ;;  %v1718_v37 = vld [vmem:[#allocation2 + $0x50] sm:$0xff]  ;;  %1570 = vst.msk [vmem:[#allocation2 + $0xb1] sm:$0xff] %vm307_vm2, %v1554_v14  ;;  %v1555_v21 = vmax.f32 %v1539_v49, 0.0  ;;  %v1486_v43 = vadd.f32 %v1485_v12, %v4386_v50  ;;  %v3437_v55 = vpop.f32.mrb[46].mxu1  ;;  %1748 = vrot.lane.b32.xlu0 %v1731_v32, %s3612_s29  ;;  %v4498_v15 = vld [vmem:[#allocation2 + $0x80] sm:$0xff] }
 0x29c   :  { %v4468_v2 = vpack.c.bf16 %v4456_v57, %v4425_v7  ;;  %v4473_v54 = vpack.c.bf16 %v1718_v37, %v4393_v22  ;;  %1573 = vst.msk [vmem:[#allocation2 + $0xe1] sm:$0xff] %vm307_vm2, %v1557_v60  ;;  %v1488_v17 = vpop.f32.mrb[47].mxu1  ;;  %v1719_v10 = vld [vmem:[#allocation2 + $0x60] sm:$0xff]  ;;  %v4481_v8 = vld [vmem:[#allocation2 + $0x52] sm:$0xff] }
 0x29d   :  { %v1494_v6 = vadd.f32 %v3436_v51, %v1397_v26  ;;  %v1400_v39 = vadd.f32 %v3227_v45, %v4308_v34  ;;  %v4477_v50 = vld [vmem:[#allocation2 + $0x61] sm:$0xff]  ;;  %1571 = vst.msk [vmem:[#allocation2 + $0xc1] sm:$0xff] %vm307_vm2, %v1555_v21  ;;  %v1519_v13 = vmul.f32 %v4316_v42, %v1486_v43  ;;  %v1489_v22 = vadd.f32 %v1488_v17, %v4400_v56  ;;  %v1720_v46 = vld [vmem:[#allocation2 + $0x70] sm:$0xff] }
 0x29e   :  { %1638 = vrot.lane.b32.xlu1 %v4468_v2, %s3612_s29  ;;  %v1732_v28 = vpack.c.bf16 %v1719_v10, %v1718_v37  ;;  %v4488_v34 = vld [vmem:[#allocation2 + $0x62] sm:$0xff]  ;;  %v4496_v1 = vpack.c.bf16 %v4470_v61, %v4477_v50  ;;  %3317 = vmatpush3.bf16.msra.mxu1 %v3577_v18  ;;  %v4508_v33 = vld [vmem:[#allocation2 + $0x72] sm:$0xff]  ;;  %v4514_v32 = vpack.c.bf16 %v4481_v8, %v4479_v63 }
 0x29f   :  { %v1521_v59 = vmul.f32 %v4316_v42, %v1494_v6  ;;  %v1497_v36 = vadd.f32 %v3437_v55, %v1400_v39  ;;  %v4500_v56 = vld [vmem:[#allocation2 + $0x81] sm:$0xff]  ;;  %v1542_v24 = vadd.f32 %v4327_v29, %v1519_v13  ;;  %v1520_v3 = vmul.f32 %v4316_v42, %v1489_v22  ;;  %v2033_v41 = vld [vmem:[#allocation2 + $0x92] sm:$0xff]  ;;  %3318 = vmatprep.subr.bf16.mxu1 %v3578_v9 }
 0x2a0   :  { %1750 = vrot.lane.b32.xlu0 %v1732_v28, %s3612_s29  ;;  %v4510_v53 = vld [vmem:[#allocation2 + $0x82] sm:$0xff]  ;;  %v4516_v30 = vpack.c.bf16 %v1720_v46, %v1719_v10  ;;  %v4522_v20 = vpack.c.bf16 %v4508_v33, %v4488_v34  ;;  %v1820_v31 = vpack.c.bf16 %v4477_v50, %v4456_v57  ;;  %v1733_v14 = vpack.c.bf16 %v4498_v15, %v1720_v46  ;;  %v4535_v51 = vld [vmem:[#allocation2 + $0x12] sm:$0xff] }
 0x2a1   :  { %v1544_v25 = vadd.f32 %v4327_v29, %v1521_v59  ;;  %v1522_v35 = vmul.f32 %v4316_v42, %v1497_v36  ;;  %v1558_v47 = vmax.f32 %v1542_v24, 0.0  ;;  %v1543_v44 = vadd.f32 %v4327_v29, %v1520_v3  ;;  %2051 = vst.msk [vmem:[#allocation3 + $0x48] sm:$0xff] %vm307_vm2, %v4514_v32  ;;  %v1610_v60 = vld [vmem:[#allocation2 + $0xa1] sm:$0xff]  ;;  %v4537_v45 = vld [vmem:[#allocation2 + $0xd1] sm:$0xff] }
 0x2a2   :  { %1640 = vrot.lane.b32.xlu1 %v4496_v1, %s3612_s29  ;;  %v1821_v49 = vpack.c.bf16 %v4500_v56, %v4470_v61  ;;  %3319 = vmatpush3.bf16.msra.mxu1 %v3579_v58  ;;  %2052 = vst.msk [vmem:[#allocation3 + $0x70] sm:$0xff] %vm307_vm2, %v4522_v20  ;;  %v2045_v26 = vpack.c.bf16 %v2033_v41, %v4510_v53  ;;  %v1724_v18 = vld [vmem:[#allocation2 + $0xd0] sm:$0xff] }
 0x2a3   :  { %v1560_v42 = vmax.f32 %v1544_v25, 0.0  ;;  %v1545_v38 = vadd.f32 %v4327_v29, %v1522_v35  ;;  %1574 = vst.msk [vmem:[#allocation2 + $0xf1] sm:$0xff] %vm307_vm2, %v1558_v47  ;;  %v1559_v12 = vmax.f32 %v1543_v44, 0.0  ;;  %v1842_v37 = vpack.c.bf16 %v4402_v4, %v4535_v51  ;;  %v4546_v29 = vld [vmem:[#allocation2 + $0xb1] sm:$0xff]  ;;  %v4548_v21 = vld [vmem:[#allocation2 + $0xe1] sm:$0xff] }
 0x2a4   :  { %1752 = vrot.lane.b32.xlu0 %v1733_v14, %s3612_s29  ;;  %v1723_v55 = vld [vmem:[#allocation2 + $0xc0] sm:$0xff]  ;;  %v1823_v17 = vpack.c.bf16 %v4548_v21, %v4537_v45  ;;  %2053 = vst.msk [vmem:[#allocation3 + $0x98] sm:$0xff] %vm307_vm2, %v2045_v26  ;;  %v4560_v4 = vld [vmem:[#allocation2 + $0xd2] sm:$0xff]  ;;  %v1622_v28 = vpack.c.bf16 %v4546_v29, %v1610_v60 }
 0x2a5   :  { %1576 = vst.msk [vmem:[#allocation2 + $0x111] sm:$0xff] %vm307_vm2, %v1560_v42  ;;  %v1561_v43 = vmax.f32 %v1545_v38, 0.0  ;;  %v4551_v6 = vld [vmem:[#allocation2 + $0xc1] sm:$0xff]  ;;  %1575 = vst.msk [vmem:[#allocation2 + $0x101] sm:$0xff] %vm307_vm2, %v1559_v12  ;;  %v4562_v10 = vpack.c.bf16 %v1724_v18, %v1723_v55  ;;  %v4574_v46 = vld [vmem:[#allocation2 + $0xb0] sm:$0xff] }
 0x2a6   :  { %v4553_v39 = vld [vmem:[#allocation2 + $0xc2] sm:$0xff]  ;;  %1858 = vrot.lane.b32.xlu1 %v1842_v37, %s3612_s29  ;;  %v1822_v22 = vpack.c.bf16 %v4551_v6, %v4546_v29  ;;  %v1734_v9 = vpack.c.bf16 %v1723_v55, %v4574_v46  ;;  %v2041_v47 = vld [vmem:[#allocation2 + $0x132] sm:$0xff]  ;;  %v1623_v37 = vpack.c.bf16 %v4537_v45, %v4551_v6 }
 0x2a7   :  { %1577 = vst.msk [vmem:[#allocation2 + $0x121] sm:$0xff] %vm307_vm2, %v1561_v43  ;;  %v4567_v13 = vpack.c.bf16 %v4560_v4, %v4553_v39  ;;  %v1725_v59 = vld [vmem:[#allocation2 + $0xe0] sm:$0xff]  ;;  %v1945_v55 = vld [vmem:[#allocation2 + $0x91] sm:$0xff] }
 0x2a8   :  { %1970 = vrot.lane.b32.xlu0 %v4435_v19, %s3612_s29  ;;  %v1837_v58 = vld [vmem:[#allocation2 + $0xe2] sm:$0xff]  ;;  %v1843_v19 = vpack.c.bf16 %v4479_v63, %v4437_v40 }
 0x2a9   :  { %2054 = vst.msk [vmem:[#allocation3 + $0xc0] sm:$0xff] %vm307_vm2, %v4567_v13 }
 0x2aa   :  { %1642 = vrot.lane.b32.xlu1 %v1622_v28, %s3612_s29  ;;  %v1726_v36 = vld [vmem:[#allocation2 + $0xf0] sm:$0xff] }
 0x2ab   :  { %v1838_v24 = vld [vmem:[#allocation2 + $0xf2] sm:$0xff]  ;;  %v4583_v25 = vpack.c.bf16 %v1726_v36, %v1725_v59 }
 0x2ac   :  { %1754 = vrot.lane.b32.xlu0 %v1734_v9, %s3612_s29  ;;  %v1728_v3 = vld [vmem:[#allocation2 + $0x110] sm:$0xff]  ;;  %v4585_v35 = vpack.c.bf16 %v1838_v24, %v1837_v58  ;;  %v1727_v44 = vld [vmem:[#allocation2 + $0x100] sm:$0xff]  ;;  %v1735_v9 = vpack.c.bf16 %v1725_v59, %v1724_v18  ;;  %v1845_v18 = vpack.c.bf16 %v4510_v53, %v4508_v33  ;;  %v1847_v53 = vpack.c.bf16 %v1837_v58, %v4560_v4 }
 0x2ad   :  { %v1840_v41 = vld [vmem:[#allocation2 + $0x112] sm:$0xff]  ;;  %v4587_v14 = vld [vmem:[#allocation2 + $0x101] sm:$0xff]  ;;  %v4592_v26 = vpack.c.bf16 %v1728_v3, %v1727_v44 }
 0x2ae   :  { %v1839_v42 = vld [vmem:[#allocation2 + $0x102] sm:$0xff]  ;;  %1860 = vrot.lane.b32.xlu1 %v1843_v19, %s3612_s29  ;;  %2055 = vst.msk [vmem:[#allocation3 + $0xe8] sm:$0xff] %vm307_vm2, %v4585_v35  ;;  %v4596_v40 = vld [vmem:[#allocation2 + $0xf1] sm:$0xff] }
 0x2af   :  { %v1841_v38 = vld [vmem:[#allocation2 + $0x122] sm:$0xff]  ;;  %v4598_v63 = vld [vmem:[#allocation2 + $0x111] sm:$0xff]  ;;  %v4600_v12 = vpack.c.bf16 %v1840_v41, %v1839_v42  ;;  %v1824_v43 = vpack.c.bf16 %v4587_v14, %v4596_v40  ;;  %v1624_v19 = vpack.c.bf16 %v4596_v40, %v4548_v21 }
 0x2b0   :  { %v4590_v60 = vld [vmem:[#allocation2 + $0x121] sm:$0xff]  ;;  %1972 = vrot.lane.b32.xlu0 %v4468_v2, %s3612_s29  ;;  %v2049_v28 = vpack.c.bf16 %v2041_v47, %v1841_v38  ;;  %v1844_v2 = vpack.c.bf16 %v4488_v34, %v4481_v8  ;;  %v1736_v47 = vpack.c.bf16 %v1727_v44, %v1726_v36  ;;  %v1957_v8 = vpack.c.bf16 %v1945_v55, %v4500_v56  ;;  %v4635_v36 = vld [vmem:[#allocation2 + $0xb2] sm:$0xff] }
 0x2b1   :  { %2056 = vst.msk [vmem:[#allocation3 + $0x110] sm:$0xff] %vm307_vm2, %v4600_v12  ;;  %v4628_v34 = vld [vmem:[#allocation2 + $0x120] sm:$0xff]  ;;  %v1846_v33 = vpack.c.bf16 %v4553_v39, %v4635_v36  ;;  %v1848_v44 = vpack.c.bf16 %v1839_v42, %v1838_v24  ;;  %v1849_v55 = vpack.c.bf16 %v1841_v38, %v1840_v41  ;;  %v3580_v41 = vld [vmem:[%s4868_s7 + $0x108] sm:$0xff]  }
 0x2b2   :  { %1644 = vrot.lane.b32.xlu1 %v1623_v37, %s3612_s29  ;;  %2057 = vst.msk [vmem:[#allocation3 + $0x138] sm:$0xff] %vm307_vm2, %v2049_v28  ;;  %v1737_v59 = vpack.c.bf16 %v4628_v34, %v1728_v3  ;;  %v1953_v3 = vld [vmem:[#allocation2 + $0x131] sm:$0xff]  ;;  %v1690_v28 = vld [vmem:[#allocation2 + $0x2] sm:$0xff] }
 0x2b3   :  { %v1961_v39 = vpack.c.bf16 %v1953_v3, %v4590_v60  ;;  %v1706_v24 = vpack.c.bf16 %v4535_v51, %v1690_v28  ;;  %v3581_v51 = vld [vmem:[%s4868_s7 + $0x110] sm:$0xff]   ;;  %v2067_v40 = vld [vmem:[#allocation3 + $0x48] sm:$0xff] }
 0x2b4   :  { %1756 = vrot.lane.b32.xlu0 %v1735_v9, %s3612_s29 }
 0x2b6   :  { %1862 = vrot.lane.b32.xlu1 %v1844_v2, %s3612_s29 }
 0x2b8   :  { %1974 = vrot.lane.b32.xlu0 %v4496_v1, %s3612_s29  ;;  %v1625_v1 = vpack.c.bf16 %v4598_v63, %v4587_v14 }
 0x2ba   :  { %1646 = vrot.lane.b32.xlu1 %v1624_v19, %s3612_s29 }
 0x2bc   :  { %1758 = vrot.lane.b32.xlu0 %v1736_v47, %s3612_s29 }
 0x2be   :  { %1864 = vrot.lane.b32.xlu1 %v1845_v18, %s3612_s29 }
 0x2c0   :  { %1976 = vrot.lane.b32.xlu0 %v1957_v8, %s3612_s29 }
 0x2c2   :  { %1648 = vrot.lane.b32.xlu1 %v1625_v1, %s3612_s29 }
 0x2c4   :  { %1760 = vrot.lane.b32.xlu0 %v1737_v59, %s3612_s29 }
 0x2c6   :  { %1866 = vrot.lane.b32.xlu1 %v1846_v33, %s3612_s29 }
 0x2c8   :  { %1978 = vrot.lane.b32.xlu0 %v1623_v37, %s3612_s29  ;;  %v1578_v37 = vld [vmem:[#allocation2] sm:$0xff] }
 0x2c9   :  { %v1594_v4 = vpack.c.bf16 %v4391_v23, %v1578_v37  ;;  %v1698_v37 = vld [vmem:[#allocation2 + $0xa2] sm:$0xff] }
 0x2ca   :  { %1868 = vrot.lane.b32.xlu1 %v1847_v53, %s3612_s29 }
 0x2cc   :  { %1980 = vrot.lane.b32.xlu0 %v1624_v19, %s3612_s29 }
 0x2ce   :  { %1870 = vrot.lane.b32.xlu1 %v1848_v44, %s3612_s29 }
 0x2d0   :  { %1982 = vrot.lane.b32.xlu0 %v1625_v1, %s3612_s29 }
 0x2d2   :  { %1872 = vrot.lane.b32.xlu1 %v1849_v55, %s3612_s29  ;;  %v1586_v55 = vld [vmem:[#allocation2 + $0xa0] sm:$0xff] }
 0x2d4   :  { %1984 = vrot.lane.b32.xlu0 %v1961_v39, %s3612_s29 }
 0x308   :  { %v1635_v58 = vpop.permute.xlu1 %1634 }
 0x309   :  { %v1652_v9 = vsel %vm307_vm2, %v1594_v4, %v1635_v58  ;;  %v1747_v42 = vpop.permute.xlu0 %1746  ;;  %v1598_v4 = vpack.c.bf16 %v4574_v46, %v1586_v55  ;;  %v3583_v55 = vld [vmem:[%s4871_s10] sm:$0xff]  }
 0x30a   :  { %v1764_v2 = vsel %vm307_vm2, %v1706_v24, %v1747_v42  ;;  %3486 = vmatprep.subr.bf16.mxu1 %v3583_v55 }
 0x30b   :  { %2442 = vmatprep.mubr.bf16.mxu0 %v1764_v2 }
 0x30c   :  { %v1637_v38 = vpop.permute.xlu1 %1636  ;;  %2443 = vmatmul.mubr.bf16.vlgmr.msra.gmra.mrb[48].mxu0 %v1652_v9  ;;  %v1710_v9 = vpack.c.bf16 %v4635_v36, %v1698_v37  ;;  %v3586_v37 = vld [vmem:[%s4871_s10 + $0x18] sm:$0xff]  }
 0x30d   :  { %v1656_v19 = vsel %vm307_vm2, %v4439_v27, %v1637_v38  ;;  %v1749_v47 = vpop.permute.xlu0 %1748  ;;  %3439 = vmatpush3.bf16.msra.mxu0 %v4412_v16  ;;  %v3582_v16 = vld [vmem:[%s4868_s7 + $0x118] sm:$0xff]  }
 0x30e   :  { %v1768_v23 = vsel %vm307_vm2, %v4444_v52, %v1749_v47  ;;  %3440 = vmatprep.subr.bf16.mxu0 %v3580_v41 }
 0x30f   :  { %2450 = vmatprep.mubr.bf16.mxu0 %v1768_v23  ;;  %v1921_v23 = vld [vmem:[#allocation2 + $0x90] sm:$0xff] }
 0x310   :  { %v1639_v18 = vpop.permute.xlu1 %1638 }
 0x311   :  { %v1660_v8 = vsel %vm307_vm2, %v4473_v54, %v1639_v18  ;;  %3441 = vmatpush3.bf16.msra.mxu0 %v3580_v41 }
 0x312   :  { %v1751_v1 = vpop.permute.xlu0 %1750  ;;  %3442 = vmatprep.subr.bf16.mxu0 %v3581_v51 }
 0x313   :  { %v1772_v59 = vsel %vm307_vm2, %v4514_v32, %v1751_v1 }
 0x314   :  { %v1641_v52 = vpop.permute.xlu1 %1640  ;;  %2451 = vmatmul.mubr.bf16.gmra.mrb[52].mxu0 %v1656_v19 }
 0x315   :  { %v1664_v33 = vsel %vm307_vm2, %v4516_v30, %v1641_v52  ;;  %2458 = vmatprep.mubr.bf16.mxu0 %v1772_v59  ;;  %3443 = vmatpush3.bf16.msra.mxu0 %v3581_v51  ;;  %v1929_v52 = vld [vmem:[#allocation2 + $0x130] sm:$0xff] }
 0x316   :  { %v1753_v53 = vpop.permute.xlu0 %1752  ;;  %3444 = vmatprep.subr.bf16.mxu0 %v3582_v16 }
 0x317   :  { %v1776_v44 = vsel %vm307_vm2, %v4522_v20, %v1753_v53  ;;  %v2062_v53 = vld [vmem:[#allocation3 + $0x20] sm:$0xff] }
 0x318   :  { %v1859_v3 = vpop.permute.xlu1 %1858 }
 0x319   :  { %v1876_v32 = vsel %vm307_vm2, %v1818_v48, %v1859_v3  ;;  %3445 = vmatpush3.bf16.msra.mxu0 %v3582_v16  ;;  %v2097_v3 = vld [vmem:[#allocation3 + $0x138] sm:$0xff] }
 0x31a   :  { %v1971_v39 = vpop.permute.xlu0 %1970  ;;  %3462 = vmatprep.subr.bf16.mxu0 %v3583_v55 }
 0x31b   :  { %v1988_v28 = vsel %vm307_vm2, %v4439_v27, %v1971_v39  ;;  %v3585_v39 = vld [vmem:[%s4871_s10 + $0x10] sm:$0xff]  }
 0x31c   :  { %v1643_v58 = vpop.permute.xlu1 %1642  ;;  %2539 = vmatprep.mubr.bf16.mxu1 %v1988_v28  ;;  %2459 = vmatmul.mubr.bf16.gmra.mrb[56].mxu0 %v1660_v8 }
 0x31d   :  { %v1668_v20 = vsel %vm307_vm2, %v1598_v4, %v1643_v58  ;;  %2540 = vmatmul.mubr.bf16.vlgmr.msra.gmra.mrb[48].mxu1 %v1876_v32  ;;  %2466 = vmatprep.mubr.bf16.mxu0 %v1776_v44  ;;  %v3584_v32 = vld [vmem:[%s4871_s10 + $0x8] sm:$0xff]  }
 0x31e   :  { %v1755_v24 = vpop.permute.xlu0 %1754  ;;  %3490 = vmatpush3.bf16.msra.mxu1 %v3583_v55 }
 0x31f   :  { %v1780_v62 = vsel %vm307_vm2, %v1710_v9, %v1755_v24  ;;  %3487 = vmatprep.subr.bf16.mxu1 %v3584_v32 }
 0x320   :  { %v1861_v0 = vpop.permute.xlu1 %1860 }
 0x321   :  { %v1880_v27 = vsel %vm307_vm2, %v1819_v5, %v1861_v0 }
 0x322   :  { %v1973_v48 = vpop.permute.xlu0 %1972  ;;  %3491 = vmatpush3.bf16.msra.mxu1 %v3584_v32 }
 0x323   :  { %v1992_v46 = vsel %vm307_vm2, %v4473_v54, %v1973_v48  ;;  %3488 = vmatprep.subr.bf16.mxu1 %v3585_v39 }
 0x324   :  { %v1645_v42 = vpop.permute.xlu1 %1644  ;;  %2547 = vmatprep.mubr.bf16.mxu1 %v1992_v46  ;;  %2467 = vmatmul.mubr.bf16.gmra.mrb[60].mxu0 %v1664_v33 }
 0x325   :  { %v1672_v36 = vsel %vm307_vm2, %v4562_v10, %v1645_v42  ;;  %2548 = vmatmul.mubr.bf16.gmra.mrb[52].mxu1 %v1880_v27  ;;  %2474 = vmatprep.mubr.bf16.mxu0 %v1780_v62 }
 0x326   :  { %v1757_v2 = vpop.permute.xlu0 %1756  ;;  %3492 = vmatpush3.bf16.msra.mxu1 %v3585_v39 }
 0x327   :  { %v1784_v41 = vsel %vm307_vm2, %v4567_v13, %v1757_v2  ;;  %3489 = vmatprep.subr.bf16.mxu1 %v3586_v37 }
 0x328   :  { %v1863_v38 = vpop.permute.xlu1 %1862 }
 0x329   :  { %v1884_v11 = vsel %vm307_vm2, %v1820_v31, %v1863_v38 }
 0x32a   :  { %v1975_v7 = vpop.permute.xlu0 %1974  ;;  %3493 = vmatpush3.bf16.msra.mxu1 %v3586_v37 }
 0x32b   :  { %v1996_v5 = vsel %vm307_vm2, %v4516_v30, %v1975_v7  ;;  %v1933_v30 = vpack.c.bf16 %v1921_v23, %v4498_v15 }
 0x32c   :  { %v1647_v54 = vpop.permute.xlu1 %1646  ;;  %2555 = vmatprep.mubr.bf16.mxu1 %v1996_v5  ;;  %2475 = vmatmul.mubr.bf16.gmra.mrb[64].mxu0 %v1668_v20 }
 0x32d   :  { %v1676_v19 = vsel %vm307_vm2, %v4583_v25, %v1647_v54  ;;  %2556 = vmatmul.mubr.bf16.gmra.mrb[56].mxu1 %v1884_v11  ;;  %2482 = vmatprep.mubr.bf16.mxu0 %v1784_v41 }
 0x32e   :  { %v1759_v47 = vpop.permute.xlu0 %1758 }
 0x32f   :  { %v1788_v13 = vsel %vm307_vm2, %v4585_v35, %v1759_v47 }
 0x330   :  { %v1865_v57 = vpop.permute.xlu1 %1864 }
 0x331   :  { %v1888_v50 = vsel %vm307_vm2, %v1821_v49, %v1865_v57 }
 0x332   :  { %v1977_v31 = vpop.permute.xlu0 %1976 }
 0x333   :  { %v2000_v51 = vsel %vm307_vm2, %v1933_v30, %v1977_v31 }
 0x334   :  { %v1649_v18 = vpop.permute.xlu1 %1648  ;;  %2563 = vmatprep.mubr.bf16.mxu1 %v2000_v51  ;;  %2483 = vmatmul.mubr.bf16.gmra.mrb[68].mxu0 %v1672_v36 }
 0x335   :  { %v1680_v8 = vsel %vm307_vm2, %v4592_v26, %v1649_v18  ;;  %2564 = vmatmul.mubr.bf16.gmra.mrb[60].mxu1 %v1888_v50  ;;  %2490 = vmatprep.mubr.bf16.mxu0 %v1788_v13 }
 0x336   :  { %v1761_v1 = vpop.permute.xlu0 %1760 }
 0x337   :  { %v1792_v35 = vsel %vm307_vm2, %v4600_v12, %v1761_v1 }
 0x338   :  { %v1867_v61 = vpop.permute.xlu1 %1866 }
 0x339   :  { %v1892_v15 = vsel %vm307_vm2, %v1822_v22, %v1867_v61 }
 0x33a   :  { %v1979_v56 = vpop.permute.xlu0 %1978 }
 0x33b   :  { %v2004_v49 = vsel %vm307_vm2, %v4562_v10, %v1979_v56 }
 0x33c   :  { %v1869_v59 = vpop.permute.xlu1 %1868  ;;  %2571 = vmatprep.mubr.bf16.mxu1 %v2004_v49  ;;  %2491 = vmatmul.mubr.bf16.gmra.mrb[72].mxu0 %v1676_v19 }
 0x33d   :  { %v1896_v16 = vsel %vm307_vm2, %v1823_v17, %v1869_v59  ;;  %2572 = vmatmul.mubr.bf16.gmra.mrb[64].mxu1 %v1892_v15  ;;  %2498 = vmatprep.mubr.bf16.mxu0 %v1792_v35  ;;  %v4874_v17 = vpack.c.bf16 %v4590_v60, %v4598_v63  ;;  %v2077_v60 = vld [vmem:[#allocation3 + $0x98] sm:$0xff]  ;;  %v2082_v63 = vld [vmem:[#allocation3 + $0xc0] sm:$0xff] }
 0x33e   :  { %v1981_v12 = vpop.permute.xlu0 %1980 }
 0x33f   :  { %v2008_v29 = vsel %vm307_vm2, %v4583_v25, %v1981_v12  ;;  %v1937_v25 = vpack.c.bf16 %v1929_v52, %v4628_v34  ;;  %v2092_v34 = vld [vmem:[#allocation3 + $0x110] sm:$0xff] }
 0x340   :  { %v1871_v6 = vpop.permute.xlu1 %1870  ;;  %2579 = vmatprep.mubr.bf16.mxu1 %v2008_v29 }
 0x341   :  { %v1900_v10 = vsel %vm307_vm2, %v1824_v43, %v1871_v6  ;;  %v2087_v43 = vld [vmem:[#allocation3 + $0xe8] sm:$0xff] }
 0x342   :  { %v1983_v22 = vpop.permute.xlu0 %1982 }
 0x343   :  { %v2012_v45 = vsel %vm307_vm2, %v4592_v26, %v1983_v22  ;;  %v2072_v26 = vld [vmem:[#allocation3 + $0x70] sm:$0xff] }
 0x344   :  { %v1873_v21 = vpop.permute.xlu1 %1872  ;;  %2499 = vmatmul.mubr.bf16.gmra.mrb[76].mxu0 %v1680_v8 }
 0x345   :  { %v1904_v33 = vsel %vm307_vm2, %v4874_v17, %v1873_v21  ;;  %2580 = vmatmul.mubr.bf16.gmra.mrb[68].mxu1 %v1896_v16  ;;  %3446 = vmatprep.mubr.msk.bf16.mxu0 %vm307_vm2, %v2062_v53 }
 0x346   :  { %v1985_v44 = vpop.permute.xlu0 %1984  ;;  %2587 = vmatprep.mubr.bf16.mxu1 %v2012_v45 }
 0x347   :  { %v2016_v14 = vsel %vm307_vm2, %v1937_v25, %v1985_v44 }
 0x34c   :  { %3447 = vmatmul.mubr.msk.bf16.vlgmr.msra.gmra.mrb[80].mxu0 %vm307_vm2, %v2067_v40 }
 0x34d   :  { %2588 = vmatmul.mubr.bf16.gmra.mrb[72].mxu1 %v1900_v10  ;;  %3450 = vmatprep.mubr.msk.bf16.mxu0 %vm307_vm2, %v2072_v26 }
 0x34e   :  { %2595 = vmatprep.mubr.bf16.mxu1 %v2016_v14  ;;  %3463 = vmatpush3.bf16.msra.mxu0 %v3583_v55 }
 0x34f   :  { %3464 = vmatprep.subr.bf16.mxu0 %v3584_v32 }
 0x352   :  { %3465 = vmatpush3.bf16.msra.mxu0 %v3584_v32 }
 0x353   :  { %3466 = vmatprep.subr.bf16.mxu0 %v3585_v39 }
 0x354   :  { %3451 = vmatmul.mubr.msk.bf16.gmra.mrb[84].mxu0 %vm307_vm2, %v2077_v60 }
 0x355   :  { %2596 = vmatmul.mubr.bf16.gmra.mrb[76].mxu1 %v1904_v33  ;;  %3454 = vmatprep.mubr.msk.bf16.mxu0 %vm307_vm2, %v2082_v63 }
 0x356   :  { %3467 = vmatpush3.bf16.msra.mxu0 %v3585_v39 }
 0x357   :  { %3468 = vmatprep.subr.bf16.mxu0 %v3586_v37 }
 0x35a   :  { %3469 = vmatpush3.bf16.msra.mxu0 %v3586_v37 }
 0x35c   :  { %3455 = vmatmul.mubr.msk.bf16.gmra.mrb[88].mxu0 %vm307_vm2, %v2087_v43 }
 0x35d   :  { %3458 = vmatprep.mubr.msk.bf16.mxu0 %vm307_vm2, %v2092_v34 }
 0x364   :  { %3459 = vmatmul.mubr.msk.bf16.gmra.mrb[92].mxu0 %vm307_vm2, %v2097_v3 }
 0x3df   :  { %v3256_v28 = vpop.f32.mrb[48].mxu0 }
 0x3e0   :  { %v3257_v4 = vpop.f32.mrb[49].mxu0 }
 0x3e1   :  { %v3258_v58 = vadd.f32 %v3257_v4, %v3256_v28  ;;  %v3259_v20 = vpop.f32.mrb[50].mxu0 }
 0x3e2   :  { %v3260_v9 = vpop.f32.mrb[51].mxu0 }
 0x3e3   :  { %v3261_v24 = vadd.f32 %v3260_v9, %v3259_v20 }
 0x3e7   :  { %v3262_v62 = vpop.f32.mrb[52].mxu0 }
 0x3e8   :  { %v3263_v0 = vpop.f32.mrb[53].mxu0 }
 0x3e9   :  { %v3264_v27 = vadd.f32 %v3263_v0, %v3262_v62  ;;  %v3265_v48 = vpop.f32.mrb[54].mxu0 }
 0x3ea   :  { %v3266_v46 = vpop.f32.mrb[55].mxu0 }
 0x3eb   :  { %v3267_v42 = vadd.f32 %v3266_v46, %v3265_v48 }
 0x3ef   :  { %v3268_v36 = vpop.f32.mrb[56].mxu0 }
 0x3f0   :  { %v3320_v2 = vpop.f32.mrb[48].mxu1  ;;  %v3269_v41 = vpop.f32.mrb[57].mxu0 }
 0x3f1   :  { %v3321_v38 = vpop.f32.mrb[49].mxu1  ;;  %v3270_v11 = vadd.f32 %v3269_v41, %v3268_v36  ;;  %v3271_v5 = vpop.f32.mrb[58].mxu0 }
 0x3f2   :  { %v3322_v7 = vadd.f32 %v3321_v38, %v3320_v2  ;;  %v3323_v54 = vpop.f32.mrb[50].mxu1  ;;  %v3272_v19 = vpop.f32.mrb[59].mxu0 }
 0x3f3   :  { %v3324_v47 = vpop.f32.mrb[51].mxu1  ;;  %v3273_v23 = vadd.f32 %v3272_v19, %v3271_v5 }
 0x3f4   :  { %v3325_v13 = vadd.f32 %v3324_v47, %v3323_v54  ;;  %v4760_v57 = vadd.f32 %v3322_v7, %v3258_v58 }
 0x3f6   :  { %v4762_v50 = vadd.f32 %v3325_v13, %v3261_v24 }
 0x3f7   :  { %v3274_v30 = vpop.f32.mrb[60].mxu0 }
 0x3f8   :  { %v3326_v31 = vpop.f32.mrb[52].mxu1  ;;  %v3275_v51 = vpop.f32.mrb[61].mxu0 }
 0x3f9   :  { %v3327_v18 = vpop.f32.mrb[53].mxu1  ;;  %v3276_v8 = vadd.f32 %v3275_v51, %v3274_v30  ;;  %v3277_v35 = vpop.f32.mrb[62].mxu0 }
 0x3fa   :  { %v3328_v1 = vadd.f32 %v3327_v18, %v3326_v31  ;;  %v3329_v61 = vpop.f32.mrb[54].mxu1  ;;  %v3278_v15 = vpop.f32.mrb[63].mxu0 }
 0x3fb   :  { %v3330_v56 = vpop.f32.mrb[55].mxu1  ;;  %v3279_v49 = vadd.f32 %v3278_v15, %v3277_v35 }
 0x3fc   :  { %v3331_v59 = vadd.f32 %v3330_v56, %v3329_v61  ;;  %v2550_v16 = vadd.f32 %v3328_v1, %v3264_v27 }
 0x3fe   :  { %v4764_v12 = vadd.f32 %v3331_v59, %v3267_v42 }
 0x3ff   :  { %v3280_v29 = vpop.f32.mrb[64].mxu0 }
 0x400   :  { %v3332_v6 = vpop.f32.mrb[56].mxu1  ;;  %v3281_v10 = vpop.f32.mrb[65].mxu0 }
 0x401   :  { %v3333_v22 = vpop.f32.mrb[57].mxu1  ;;  %v3282_v52 = vadd.f32 %v3281_v10, %v3280_v29  ;;  %v3283_v21 = vpop.f32.mrb[66].mxu0  ;;  %v4788_v10 = vld [vmem:[%s4870_s9] ss:$0 sm:$0xff] }
 0x402   :  { %v3334_v45 = vadd.f32 %v3333_v22, %v3332_v6  ;;  %v3335_v17 = vpop.f32.mrb[58].mxu1  ;;  %v3284_v33 = vpop.f32.mrb[67].mxu0 }
 0x403   :  { %v3336_v25 = vpop.f32.mrb[59].mxu1  ;;  %v3285_v53 = vadd.f32 %v3284_v33, %v3283_v21 }
 0x404   :  { %v3337_v44 = vadd.f32 %v3336_v25, %v3335_v17  ;;  %v4766_v14 = vadd.f32 %v3334_v45, %v3270_v11 }
 0x406   :  { %v4768_v40 = vadd.f32 %v3337_v44, %v3273_v23 }
 0x407   :  { %v3286_v26 = vpop.f32.mrb[68].mxu0 }
 0x408   :  { %v3338_v60 = vpop.f32.mrb[60].mxu1  ;;  %v3287_v63 = vpop.f32.mrb[69].mxu0 }
 0x409   :  { %v3339_v43 = vpop.f32.mrb[61].mxu1  ;;  %v3288_v34 = vadd.f32 %v3287_v63, %v3286_v26  ;;  %v3289_v55 = vpop.f32.mrb[70].mxu0 }
 0x40a   :  { %v3340_v3 = vadd.f32 %v3339_v43, %v3338_v60  ;;  %v3341_v32 = vpop.f32.mrb[62].mxu1  ;;  %v3290_v39 = vpop.f32.mrb[71].mxu0 }
 0x40b   :  { %v3342_v37 = vpop.f32.mrb[63].mxu1  ;;  %v3291_v28 = vadd.f32 %v3290_v39, %v3289_v55 }
 0x40c   :  { %v3343_v4 = vadd.f32 %v3342_v37, %v3341_v32  ;;  %v2566_v58 = vadd.f32 %v3340_v3, %v3276_v8 }
 0x40e   :  { %v4770_v20 = vadd.f32 %v3343_v4, %v3279_v49  ;;  %v4783_v49 = vld [vmem:[%s4869_s8] ss:$0 sm:$0xff] }
 0x40f   :  { %v3292_v9 = vpop.f32.mrb[72].mxu0 }
 0x410   :  { %v3344_v24 = vpop.f32.mrb[64].mxu1  ;;  %v3293_v62 = vpop.f32.mrb[73].mxu0 }
 0x411   :  { %v3345_v0 = vpop.f32.mrb[65].mxu1  ;;  %v3294_v27 = vadd.f32 %v3293_v62, %v3292_v9  ;;  %v3295_v46 = vpop.f32.mrb[74].mxu0 }
 0x412   :  { %v3346_v48 = vadd.f32 %v3345_v0, %v3344_v24  ;;  %v3347_v42 = vpop.f32.mrb[66].mxu1  ;;  %v3296_v36 = vpop.f32.mrb[75].mxu0 }
 0x413   :  { %v3348_v2 = vpop.f32.mrb[67].mxu1  ;;  %v3297_v41 = vadd.f32 %v3296_v36, %v3295_v46 }
 0x414   :  { %v3349_v38 = vadd.f32 %v3348_v2, %v3347_v42  ;;  %v4772_v11 = vadd.f32 %v3346_v48, %v3282_v52 }
 0x416   :  { %v4774_v7 = vadd.f32 %v3349_v38, %v3285_v53 }
 0x417   :  { %v3298_v5 = vpop.f32.mrb[76].mxu0 }
 0x418   :  { %v3350_v54 = vpop.f32.mrb[68].mxu1  ;;  %v3299_v19 = vpop.f32.mrb[77].mxu0 }
 0x419   :  { %v3351_v47 = vpop.f32.mrb[69].mxu1  ;;  %v3300_v23 = vadd.f32 %v3299_v19, %v3298_v5  ;;  %v3301_v30 = vpop.f32.mrb[78].mxu0 }
 0x41a   :  { %v3352_v13 = vadd.f32 %v3351_v47, %v3350_v54  ;;  %v3353_v31 = vpop.f32.mrb[70].mxu1  ;;  %v3302_v51 = vpop.f32.mrb[79].mxu0 }
 0x41b   :  { %v3354_v18 = vpop.f32.mrb[71].mxu1  ;;  %v3303_v8 = vadd.f32 %v3302_v51, %v3301_v30 }
 0x41c   :  { %v3355_v1 = vadd.f32 %v3354_v18, %v3353_v31  ;;  %v4776_v35 = vadd.f32 %v3352_v13, %v3288_v34 }
 0x41e   :  { %v4778_v61 = vadd.f32 %v3355_v1, %v3291_v28 }
 0x41f   :  { %v3448_v56 = vpop.f32.mrb[80].mxu0 }
 0x420   :  { %v3356_v15 = vpop.f32.mrb[72].mxu1  ;;  %v2647_v59 = vadd.f32 %v3448_v56, %v2550_v16  ;;  %v2638_v6 = vpop.f32.mrb[81].mxu0 }
 0x421   :  { %v3357_v29 = vpop.f32.mrb[73].mxu1  ;;  %v2639_v52 = vadd.f32 %v2638_v6, %v4760_v57  ;;  %v3449_v21 = vpop.f32.mrb[82].mxu0 }
 0x422   :  { %v3358_v22 = vadd.f32 %v3357_v29, %v3356_v15  ;;  %v3359_v45 = vpop.f32.mrb[74].mxu1  ;;  %v2710_v17 = vmul.f32 %v4783_v49, %v2647_v59  ;;  %v2650_v33 = vadd.f32 %v3449_v21, %v4764_v12  ;;  %v2641_v53 = vpop.f32.mrb[83].mxu0 }
 0x423   :  { %v3360_v25 = vpop.f32.mrb[75].mxu1  ;;  %v2708_v16 = vmul.f32 %v4783_v49, %v2639_v52  ;;  %v2642_v26 = vadd.f32 %v2641_v53, %v4762_v50 }
 0x424   :  { %v3361_v44 = vadd.f32 %v3360_v25, %v3359_v45  ;;  %v4795_v60 = vadd.f32 %v3358_v22, %v3294_v27  ;;  %v2733_v63 = vadd.f32 %v4788_v10, %v2710_v17  ;;  %v2711_v43 = vmul.f32 %v4783_v49, %v2650_v33 }
 0x425   :  { %v2731_v57 = vadd.f32 %v4788_v10, %v2708_v16  ;;  %v2709_v34 = vmul.f32 %v4783_v49, %v2642_v26 }
 0x426   :  { %v4801_v3 = vadd.f32 %v3361_v44, %v3297_v41  ;;  %v2734_v12 = vadd.f32 %v4788_v10, %v2711_v43  ;;  %v2749_v37 = vmax.f32 %v2733_v63, 0.0 }
 0x427   :  { %v2732_v55 = vadd.f32 %v4788_v10, %v2709_v34  ;;  %v3452_v39 = vpop.f32.mrb[84].mxu0  ;;  %v2747_v24 = vmax.f32 %v2731_v57, 0.0 }
 0x428   :  { %v3362_v32 = vpop.f32.mrb[76].mxu1  ;;  %v2750_v50 = vmax.f32 %v2734_v12, 0.0  ;;  %v2663_v28 = vadd.f32 %v3452_v39, %v2566_v58  ;;  %v2654_v9 = vpop.f32.mrb[85].mxu0 }
 0x429   :  { %v3363_v4 = vpop.f32.mrb[77].mxu1  ;;  %v2748_v62 = vmax.f32 %v2732_v55, 0.0  ;;  %v2655_v27 = vadd.f32 %v2654_v9, %v4766_v14  ;;  %v3453_v46 = vpop.f32.mrb[86].mxu0 }
 0x42a   :  { %v3364_v0 = vadd.f32 %v3363_v4, %v3362_v32  ;;  %v3365_v48 = vpop.f32.mrb[78].mxu1  ;;  %v2764_v42 = vpack.c.bf16 %v2750_v50, %v2749_v37  ;;  %v2714_v36 = vmul.f32 %v4783_v49, %v2663_v28  ;;  %v2666_v2 = vadd.f32 %v3453_v46, %v4770_v20  ;;  %v2657_v38 = vpop.f32.mrb[87].mxu0 }
 0x42b   :  { %v3366_v41 = vpop.f32.mrb[79].mxu1  ;;  %v2763_v5 = vpack.c.bf16 %v2748_v62, %v2747_v24  ;;  %v2712_v54 = vmul.f32 %v4783_v49, %v2655_v27  ;;  %v2658_v19 = vadd.f32 %v2657_v38, %v4768_v40 }
 0x42c   :  { %v3367_v58 = vadd.f32 %v3366_v41, %v3365_v48  ;;  %v2737_v47 = vadd.f32 %v4788_v10, %v2714_v36  ;;  %v2715_v13 = vmul.f32 %v4783_v49, %v2666_v2  ;;  %v2598_v14 = vadd.f32 %v3364_v0, %v3300_v23 }
 0x42d   :  { %v2735_v30 = vadd.f32 %v4788_v10, %v2712_v54  ;;  %v2713_v31 = vmul.f32 %v4783_v49, %v2658_v19  ;;  %3470 = vmatprep.mubr.msk.bf16.mxu0 %vm307_vm2, %v2763_v5 }
 0x42e   :  { %v2601_v20 = vadd.f32 %v3367_v58, %v3303_v8  ;;  %v2738_v51 = vadd.f32 %v4788_v10, %v2715_v13  ;;  %3471 = vmatmul.mubr.msk.bf16.vlgmr.msra.gmra.mrb[96].mxu0 %vm307_vm2, %v2764_v42  ;;  %v2753_v40 = vmax.f32 %v2737_v47, 0.0 }
 0x42f   :  { %v2736_v18 = vadd.f32 %v4788_v10, %v2713_v31  ;;  %v3456_v1 = vpop.f32.mrb[88].mxu0  ;;  %v2751_v23 = vmax.f32 %v2735_v30, 0.0 }
 0x430   :  { %v2754_v15 = vmax.f32 %v2738_v51, 0.0  ;;  %v2679_v56 = vadd.f32 %v3456_v1, %v4776_v35  ;;  %v2670_v59 = vpop.f32.mrb[89].mxu0 }
 0x431   :  { %v2752_v29 = vmax.f32 %v2736_v18, 0.0  ;;  %v2671_v6 = vadd.f32 %v2670_v59, %v4772_v11  ;;  %v3457_v22 = vpop.f32.mrb[90].mxu0 }
 0x432   :  { %v2766_v52 = vpack.c.bf16 %v2754_v15, %v2753_v40  ;;  %v2718_v8 = vmul.f32 %v4783_v49, %v2679_v56  ;;  %v2682_v45 = vadd.f32 %v3457_v22, %v4778_v61  ;;  %v2673_v21 = vpop.f32.mrb[91].mxu0 }
 0x433   :  { %v2765_v17 = vpack.c.bf16 %v2752_v29, %v2751_v23  ;;  %v2716_v33 = vmul.f32 %v4783_v49, %v2671_v6  ;;  %v2674_v25 = vadd.f32 %v2673_v21, %v4774_v7 }
 0x434   :  { %v2741_v53 = vadd.f32 %v4788_v10, %v2718_v8  ;;  %v2719_v35 = vmul.f32 %v4783_v49, %v2682_v45 }
 0x435   :  { %v2739_v16 = vadd.f32 %v4788_v10, %v2716_v33  ;;  %v2717_v11 = vmul.f32 %v4783_v49, %v2674_v25  ;;  %3474 = vmatprep.mubr.msk.bf16.mxu1 %vm307_vm2, %v2765_v17 }
 0x436   :  { %v2742_v44 = vadd.f32 %v4788_v10, %v2719_v35  ;;  %3475 = vmatmul.mubr.msk.bf16.vlgmr.msra.gmra.mrb[80].mxu1 %vm307_vm2, %v2766_v52  ;;  %v2757_v63 = vmax.f32 %v2741_v53, 0.0 }
 0x437   :  { %v2740_v61 = vadd.f32 %v4788_v10, %v2717_v11  ;;  %v3460_v26 = vpop.f32.mrb[92].mxu0  ;;  %v2755_v34 = vmax.f32 %v2739_v16, 0.0 }
 0x438   :  { %v2758_v43 = vmax.f32 %v2742_v44, 0.0  ;;  %v2695_v7 = vadd.f32 %v3460_v26, %v2598_v14  ;;  %v2686_v57 = vpop.f32.mrb[93].mxu0 }
 0x439   :  { %v2756_v12 = vmax.f32 %v2740_v61, 0.0  ;;  %v2687_v55 = vadd.f32 %v2686_v57, %v4795_v60  ;;  %v3461_v32 = vpop.f32.mrb[94].mxu0 }
 0x43a   :  { %v2768_v39 = vpack.c.bf16 %v2758_v43, %v2757_v63  ;;  %v2722_v37 = vmul.f32 %v4783_v49, %v2695_v7  ;;  %v2698_v50 = vadd.f32 %v3461_v32, %v2601_v20  ;;  %v2689_v28 = vpop.f32.mrb[95].mxu0 }
 0x43b   :  { %v2767_v4 = vpack.c.bf16 %v2756_v12, %v2755_v34  ;;  %v2720_v9 = vmul.f32 %v4783_v49, %v2687_v55  ;;  %v2690_v24 = vadd.f32 %v2689_v28, %v4801_v3 }
 0x43c   :  { %v2745_v62 = vadd.f32 %v4788_v10, %v2722_v37  ;;  %v2723_v0 = vmul.f32 %v4783_v49, %v2698_v50 }
 0x43d   :  { %v2743_v27 = vadd.f32 %v4788_v10, %v2720_v9  ;;  %v2721_v48 = vmul.f32 %v4783_v49, %v2690_v24  ;;  %3478 = vmatprep.mubr.msk.bf16.mxu1 %vm307_vm2, %v2767_v4  ;;  %v3076_v49 = vld [vmem:[%s4872_s11] ss:$0 sm:$0xff]  ;;  %s3613_s11 = smov [#allocation4]  }
 0x43e   :  { %v2746_v60 = vadd.f32 %v4788_v10, %v2723_v0  ;;  %3479 = vmatmul.mubr.msk.bf16.gmra.mrb[84].mxu1 %vm307_vm2, %v2768_v39  ;;  %v2761_v42 = vmax.f32 %v2745_v62, 0.0  ;;  %s2952_s30 = sshll.u32 %s3613_s11, 4  ;;  %s2953_s30 = int_to_ptr.vmem [resolvable:$true] %s2952_s30 }
 0x43f   :  { %v2744_v46 = vadd.f32 %v4788_v10, %v2721_v48  ;;  %v2759_v2 = vmax.f32 %v2743_v27, 0.0  ;;  %s3587_s2 = scalar_lea.vmem %s2953_s30, 2048  ;;  %p3592_p1 = scmp.lt.s32.totalorder %s2953_s30, %s2953_s30 }
 0x440   :  { %v2762_v36 = vmax.f32 %v2746_v60, 0.0  ;;  %p3588_p0 = scmp.ne.s32.totalorder %s2953_s30, %s3587_s2  ;;  %p3593_p2 = scmp.lt.s32.totalorder %s3587_s2, %s3587_s2 }
 0x441   :  { %v2760_v3 = vmax.f32 %v2744_v46, 0.0 }
 0x442   :  { %v2770_v41 = vpack.c.bf16 %v2762_v36, %v2761_v42  ;;  %p3594_p3 = por %p3593_p2, %p3592_p1 }
 0x443   :  { %v2769_v38 = vpack.c.bf16 %v2760_v3, %v2759_v2 }
 0x444   :  { %p3595_p4 = pnand %p3594_p3, %p3588_p0 }
 0x445   :  { %3482 = vmatprep.mubr.msk.bf16.mxu1 %vm307_vm2, %v2769_v38 }
 0x446   :  { %3483 = vmatmul.mubr.msk.bf16.gmra.mrb[88].mxu1 %vm307_vm2, %v2770_v41 }
 0x501   :  { %v3472_v5 = vpop.f32.mrb[96].mxu0 }
 0x502   :  { %v2877_v54 = vadd.f32 %v3472_v5, %v3076_v49  ;;  %v2868_v58 = vpop.f32.mrb[97].mxu0 }
 0x503   :  { %v2869_v19 = vadd.f32 %v3076_v49, %v2868_v58  ;;  %v3473_v47 = vpop.f32.mrb[98].mxu0 }
 0x504   :  { %2933 = vst [vmem:[#allocation4 + $0x10] sm:$0xff] %v2877_v54  ;;  %v2880_v10 = vadd.f32 %v3473_v47, %v3076_v49  ;;  %v2871_v13 = vpop.f32.mrb[99].mxu0 }
 0x505   :  { %2931 = vst [vmem:[#allocation4] sm:$0xff] %v2869_v19  ;;  %v2872_v14 = vadd.f32 %v3076_v49, %v2871_v13 }
 0x506   :  { %2934 = vst [vmem:[#allocation4 + $0x18] sm:$0xff] %v2880_v10 }
 0x507   :  { %2932 = vst [vmem:[#allocation4 + $0x8] sm:$0xff] %v2872_v14 }
 0x509   :  { %v3476_v30 = vpop.f32.mrb[80].mxu1 }
 0x50a   :  { %v2893_v31 = vadd.f32 %v3476_v30, %v3076_v49  ;;  %v2884_v20 = vpop.f32.mrb[81].mxu1 }
 0x50b   :  { %v2885_v51 = vadd.f32 %v3076_v49, %v2884_v20  ;;  %v3477_v18 = vpop.f32.mrb[82].mxu1 }
 0x50c   :  { %2937 = vst [vmem:[#allocation4 + $0x30] sm:$0xff] %v2893_v31  ;;  %v2896_v1 = vadd.f32 %v3477_v18, %v3076_v49  ;;  %v2887_v40 = vpop.f32.mrb[83].mxu1 }
 0x50d   :  { %2935 = vst [vmem:[#allocation4 + $0x20] sm:$0xff] %v2885_v51  ;;  %v2888_v15 = vadd.f32 %v3076_v49, %v2887_v40 }
 0x50e   :  { %2938 = vst [vmem:[#allocation4 + $0x38] sm:$0xff] %v2896_v1 }
 0x50f   :  { %2936 = vst [vmem:[#allocation4 + $0x28] sm:$0xff] %v2888_v15 }
 0x511   :  { %v3480_v56 = vpop.f32.mrb[84].mxu1 }
 0x512   :  { %v2909_v59 = vadd.f32 %v3480_v56, %v3076_v49  ;;  %v2900_v23 = vpop.f32.mrb[85].mxu1 }
 0x513   :  { %v2901_v29 = vadd.f32 %v3076_v49, %v2900_v23  ;;  %v3481_v6 = vpop.f32.mrb[86].mxu1 }
 0x514   :  { %2941 = vst [vmem:[#allocation4 + $0x50] sm:$0xff] %v2909_v59  ;;  %v2912_v22 = vadd.f32 %v3481_v6, %v3076_v49  ;;  %v2903_v52 = vpop.f32.mrb[87].mxu1 }
 0x515   :  { %2939 = vst [vmem:[#allocation4 + $0x40] sm:$0xff] %v2901_v29  ;;  %v2904_v8 = vadd.f32 %v3076_v49, %v2903_v52 }
 0x516   :  { %2942 = vst [vmem:[#allocation4 + $0x58] sm:$0xff] %v2912_v22 }
 0x517   :  { %2940 = vst [vmem:[#allocation4 + $0x48] sm:$0xff] %v2904_v8 }
 0x519   :  { %v3484_v45 = vpop.f32.mrb[88].mxu1 }
 0x51a   :  { %v2925_v21 = vadd.f32 %v3484_v45, %v3076_v49  ;;  %v2916_v17 = vpop.f32.mrb[89].mxu1 }
 0x51b   :  { %v2917_v33 = vadd.f32 %v3076_v49, %v2916_v17  ;;  %v3485_v25 = vpop.f32.mrb[90].mxu1 }
 0x51c   :  { %2945 = vst [vmem:[#allocation4 + $0x70] sm:$0xff] %v2925_v21  ;;  %v2928_v53 = vadd.f32 %v3485_v25, %v3076_v49  ;;  %v2919_v35 = vpop.f32.mrb[91].mxu1 }
 0x51d   :  { %2943 = vst [vmem:[#allocation4 + $0x60] sm:$0xff] %v2917_v33  ;;  %v2920_v16 = vadd.f32 %v3076_v49, %v2919_v35 }
 0x51e   :  { %2946 = vst [vmem:[#allocation4 + $0x78] sm:$0xff] %v2928_v53 }
 0x51f   :  { %2944 = vst [vmem:[#allocation4 + $0x68] sm:$0xff] %v2920_v16 }
 0x520   :  { %3598 = shalt.err (!%p3595_p4)
}
 0x521   :  { %s3599_s6 = scalar_lea.hbm %s4873_s12, 2048 }
 0x522   :  { %p3600_p5 = scmp.ne.s32.totalorder %s4873_s12, %s3599_s6  ;;  %p3603_p6 = scmp.lt.u32.totalorder %s3599_s6, %s4873_s12 }
 0x524   :  { %p3605_p7 = pnand %p3603_p6, %p3600_p5 }
 0x526   :  { %3608 = shalt.err (!%p3605_p7)
}
 0x527   :  { %s3614_s4 = smov 128   ;;  %s3615_s16 = smov 8  }
 0x528   :  { %2958 = dma.vmem_to_hbm [thread:$0]  %s2953_s30, 2048, %s4873_s12, [#allocation5], %s3614_s4, %s3614_s4, %s3615_s16  }
 0x529   :  { %3609 = dma.done.wait [#allocation5], 2048  }
 0x52a   :  { %3610 = vsyncadd [#allocation5], 4294965248 }
 0x52b   :  { %2962 = vsyncpa [#allocation5], 1 }

</bundles_post_ra>
